<compile_context>
chip_gen: v6e
topology: v6e:2x2x1
jax: 0.10.0
libtpu: 0.0.40
codegen_flags: <defaults>
</compile_context>

<pallas_src>
import jax
import jax.numpy as jnp
import numpy as np
from jax.experimental import pallas as pl
from jax.experimental.pallas import tpu as pltpu


# ----------------------------------------------------------------------------
# Fused kernel: all LSTM layers + Linear head, single launch, no grid.
# ----------------------------------------------------------------------------
def _make_fused_lstm_kernel(num_layers, S, B, H, O):
    """Ref order: x, (wih, whh, b) * num_layers, w_out, b_out, out_ref, act_scr."""

    def kernel(*refs):
        x_ref = refs[0]
        layer_refs = refs[1:1 + 3 * num_layers]
        w_out_ref = refs[1 + 3 * num_layers]
        b_out_ref = refs[2 + 3 * num_layers]
        out_ref = refs[3 + 3 * num_layers]
        act_scr = refs[4 + 3 * num_layers]        # (B, S, H) inter-layer activations

        h = None
        for l in range(num_layers):
            wih = layer_refs[3 * l][...]          # (Din_l, 4H)  gate-fused
            whh = layer_refs[3 * l + 1][...]      # (H,    4H)
            b = layer_refs[3 * l + 2][...]        # (1,    4H)

            cur = x_ref[...] if l == 0 else act_scr[...]   # (B, S, Din_l)
            din = cur.shape[-1]

            # Hoisted, gate-fused input projection for all timesteps at once.
            xp = jnp.dot(cur.reshape(B * S, din), wih,
                         preferred_element_type=jnp.float32) + b   # (B*S, 4H)
            xp = xp.reshape(B, S, 4 * H)

            h = jnp.zeros((B, H), jnp.float32)
            c = jnp.zeros((B, H), jnp.float32)
            is_last_layer = (l == num_layers - 1)

            # Static, fully-unrolled time loop: only the h-recurrence is serial.
            for t in range(S):
                gates = xp[:, t, :] + jnp.dot(
                    h, whh, preferred_element_type=jnp.float32)    # (B, 4H)
                i = jax.nn.sigmoid(gates[:, 0:H])
                f = jax.nn.sigmoid(gates[:, H:2 * H])
                g = jnp.tanh(gates[:, 2 * H:3 * H])
                o = jax.nn.sigmoid(gates[:, 3 * H:4 * H])
                c = f * c + i * g
                h = o * jnp.tanh(c)
                if not is_last_layer:
                    act_scr[:, t, :] = h          # feed next layer (VMEM only)

        # Final Linear on the last layer's final hidden state.
        out_ref[...] = jnp.dot(h, w_out_ref[...],
                               preferred_element_type=jnp.float32) + b_out_ref[...]

    return kernel


def _full_block_spec(arr):
    n = arr.ndim
    return pl.BlockSpec(arr.shape, lambda n=n: (0,) * n)


def lstm_forward_pallas(t_bsf, params):
    """Mirrors LSTM.forward: returns linear(h_n[-1])[0], shape (output_size,)."""
    B, S, _ = t_bsf.shape
    layers = params["layers"]
    num_layers = len(layers)
    H = layers[0][1].shape[0]                     # whh is (H, 4H)
    O = params["w_out"].shape[-1]

    flat_inputs = [t_bsf]
    for (wih, whh, b) in layers:
        flat_inputs += [wih, whh, b]
    flat_inputs += [params["w_out"], params["b_out"]]

    in_specs = [_full_block_spec(a) for a in flat_inputs]

    out = pl.pallas_call(
        _make_fused_lstm_kernel(num_layers, S, B, H, O),
        out_shape=jax.ShapeDtypeStruct((B, O), jnp.float32),
        in_specs=in_specs,
        out_specs=pl.BlockSpec((B, O), lambda: (0, 0)),
        scratch_shapes=[pltpu.VMEM((B, S, H), jnp.float32)],
    )(*flat_inputs)
    return out[0]


lstm_forward = jax.jit(lstm_forward_pallas)


# ----------------------------------------------------------------------------
# Deterministic parameter init (gate-fused layout; shapes from nn.LSTM / nn.Linear)
# ----------------------------------------------------------------------------
def init_params(key, input_size, hidden_size, num_layers, output_size):
    bound = 1.0 / np.sqrt(hidden_size)
    layers = []
    for layer in range(num_layers):
        din = input_size if layer == 0 else hidden_size
        key, k1, k2, k3, k4 = jax.random.split(key, 5)
        wih = jax.random.uniform(k1, (din, 4 * hidden_size), jnp.float32, -bound, bound)
        whh = jax.random.uniform(k2, (hidden_size, 4 * hidden_size), jnp.float32, -bound, bound)
        b_ih = jax.random.uniform(k3, (1, 4 * hidden_size), jnp.float32, -bound, bound)
        b_hh = jax.random.uniform(k4, (1, 4 * hidden_size), jnp.float32, -bound, bound)
        layers.append((wih, whh, b_ih + b_hh))
    key, k5, k6 = jax.random.split(key, 3)
    w_out = jax.random.uniform(k5, (hidden_size, output_size), jnp.float32, -bound, bound)
    b_out = jax.random.uniform(k6, (1, output_size), jnp.float32, -bound, bound)
    return {"layers": layers, "w_out": w_out, "b_out": b_out}


# ----------------------------------------------------------------------------
# Pure-JAX reference (sanity check of the Pallas kernel)
# ----------------------------------------------------------------------------
def reference_forward(t_bsf, params):
    B, S, _ = t_bsf.shape
    cur = t_bsf
    h = None
    for (wih, whh, b) in params["layers"]:
        H = whh.shape[0]
        h = jnp.zeros((B, H), jnp.float32)
        c = jnp.zeros((B, H), jnp.float32)
        ys = []
        for s in range(S):
            xt = cur[:, s, :]
            gates = xt @ wih + h @ whh + b
            i = jax.nn.sigmoid(gates[:, 0:H])
            f = jax.nn.sigmoid(gates[:, H:2 * H])
            g = jnp.tanh(gates[:, 2 * H:3 * H])
            o = jax.nn.sigmoid(gates[:, 3 * H:4 * H])
            c = f * c + i * g
            h = o * jnp.tanh(c)
            ys.append(h)
        cur = jnp.stack(ys, axis=1)
    out = h @ params["w_out"] + params["b_out"]
    return out[0]


if __name__ == "__main__":
    # Small shapes consistent with the module's forward.
    input_size, hidden_size, num_layers, output_size, batch_size = 4, 32, 2, 8, 2
    seq_len = 8

    key = jax.random.PRNGKey(0)
    key, kx = jax.random.split(key)
    t = jax.random.normal(kx, (batch_size, seq_len, input_size), jnp.float32)

    params = init_params(key, input_size, hidden_size, num_layers, output_size)

    out = jax.block_until_ready(lstm_forward(t, params))
    ref = jax.block_until_ready(reference_forward(t, params))

    np.testing.assert_allclose(np.asarray(out), np.asarray(ref), rtol=1e-3, atol=1e-3)
    assert out.shape == (output_size,)

    print("KERNEL_OK")
</pallas_src>

<mosaic_0001>
module attributes {stable_mosaic.version = 11 : i64} {
  func.func @kernel(%arg0: memref<2x8x4xf32, #tpu.memory_space<vmem>>, %arg1: memref<4x128xf32, #tpu.memory_space<vmem>>, %arg2: memref<32x128xf32, #tpu.memory_space<vmem>>, %arg3: memref<1x128xf32, #tpu.memory_space<vmem>>, %arg4: memref<32x128xf32, #tpu.memory_space<vmem>>, %arg5: memref<32x128xf32, #tpu.memory_space<vmem>>, %arg6: memref<1x128xf32, #tpu.memory_space<vmem>>, %arg7: memref<32x8xf32, #tpu.memory_space<vmem>>, %arg8: memref<1x8xf32, #tpu.memory_space<vmem>>, %arg9: memref<2x8xf32, #tpu.memory_space<vmem>>, %arg10: memref<2x8x32xf32, #tpu.memory_space<vmem>>) attributes {dimension_semantics = [], scalar_prefetch = 0 : i64, scratch_operands = 1 : i64, tpu.core_type = #tpu.core_type<tc>} {
    %c0 = arith.constant 0 : index
    %c0_0 = arith.constant 0 : index
    %0 = vector.load %arg1[%c0, %c0_0] : memref<4x128xf32, #tpu.memory_space<vmem>>, vector<4x128xf32>
    %c0_1 = arith.constant 0 : index
    %c0_2 = arith.constant 0 : index
    %1 = vector.load %arg2[%c0_1, %c0_2] : memref<32x128xf32, #tpu.memory_space<vmem>>, vector<32x128xf32>
    %c0_3 = arith.constant 0 : index
    %c0_4 = arith.constant 0 : index
    %2 = vector.load %arg3[%c0_3, %c0_4] : memref<1x128xf32, #tpu.memory_space<vmem>>, vector<1x128xf32>
    %c0_5 = arith.constant 0 : index
    %c0_6 = arith.constant 0 : index
    %c0_7 = arith.constant 0 : index
    %3 = vector.load %arg0[%c0_5, %c0_6, %c0_7] : memref<2x8x4xf32, #tpu.memory_space<vmem>>, vector<2x8x4xf32>
    %4 = vector.shape_cast %3 : vector<2x8x4xf32> to vector<16x4xf32>
    %cst = arith.constant dense<0.000000e+00> : vector<16x128xf32>
    %5 = tpu.matmul %4, %0, %cst {dimension_numbers = #tpu.dot_dimension_numbers<[1], [0], [0], [1], [0, 0, 1, 1], [], []>} : vector<16x4xf32>, vector<4x128xf32>, vector<16x128xf32> -> vector<16x128xf32>
    %6 = vector.broadcast %2 : vector<1x128xf32> to vector<16x128xf32>
    %7 = arith.addf %5, %6 : vector<16x128xf32>
    %8 = vector.shape_cast %7 : vector<16x128xf32> to vector<2x8x128xf32>
    %cst_8 = arith.constant 0.000000e+00 : f32
    %9 = vector.broadcast %cst_8 : f32 to vector<2x32xf32>
    %cst_9 = arith.constant 0.000000e+00 : f32
    %10 = vector.broadcast %cst_9 : f32 to vector<2x32xf32>
    %11 = vector.extract_strided_slice %8 {offsets = [0, 0, 0], sizes = [2, 1, 128], strides = [1, 1, 1]} : vector<2x8x128xf32> to vector<2x1x128xf32>
    %12 = vector.shape_cast %11 : vector<2x1x128xf32> to vector<2x128xf32>
    %cst_10 = arith.constant dense<0.000000e+00> : vector<2x128xf32>
    %13 = tpu.matmul %9, %1, %cst_10 {dimension_numbers = #tpu.dot_dimension_numbers<[1], [0], [0], [1], [0, 0, 1, 1], [], []>} : vector<2x32xf32>, vector<32x128xf32>, vector<2x128xf32> -> vector<2x128xf32>
    %14 = arith.addf %12, %13 : vector<2x128xf32>
    %15 = vector.extract_strided_slice %14 {offsets = [0, 0], sizes = [2, 32], strides = [1, 1]} : vector<2x128xf32> to vector<2x32xf32>
    %16 = arith.negf %15 : vector<2x32xf32>
    %17 = math.exp %16 : vector<2x32xf32>
    %cst_11 = arith.constant 1.000000e+00 : f32
    %18 = vector.broadcast %cst_11 : f32 to vector<2x32xf32>
    %19 = arith.addf %18, %17 : vector<2x32xf32>
    %20 = arith.divf %18, %19 : vector<2x32xf32>
    %21 = vector.extract_strided_slice %14 {offsets = [0, 32], sizes = [2, 32], strides = [1, 1]} : vector<2x128xf32> to vector<2x32xf32>
    %22 = arith.negf %21 : vector<2x32xf32>
    %23 = math.exp %22 : vector<2x32xf32>
    %cst_12 = arith.constant 1.000000e+00 : f32
    %24 = vector.broadcast %cst_12 : f32 to vector<2x32xf32>
    %25 = arith.addf %24, %23 : vector<2x32xf32>
    %26 = arith.divf %24, %25 : vector<2x32xf32>
    %27 = vector.extract_strided_slice %14 {offsets = [0, 64], sizes = [2, 32], strides = [1, 1]} : vector<2x128xf32> to vector<2x32xf32>
    %28 = math.tanh %27 : vector<2x32xf32>
    %29 = vector.extract_strided_slice %14 {offsets = [0, 96], sizes = [2, 32], strides = [1, 1]} : vector<2x128xf32> to vector<2x32xf32>
    %30 = arith.negf %29 : vector<2x32xf32>
    %31 = math.exp %30 : vector<2x32xf32>
    %cst_13 = arith.constant 1.000000e+00 : f32
    %32 = vector.broadcast %cst_13 : f32 to vector<2x32xf32>
    %33 = arith.addf %32, %31 : vector<2x32xf32>
    %34 = arith.divf %32, %33 : vector<2x32xf32>
    %35 = arith.mulf %26, %10 : vector<2x32xf32>
    %36 = arith.mulf %20, %28 : vector<2x32xf32>
    %37 = arith.addf %35, %36 : vector<2x32xf32>
    %38 = math.tanh %37 : vector<2x32xf32>
    %39 = arith.mulf %34, %38 : vector<2x32xf32>
    %c0_14 = arith.constant 0 : index
    %c0_15 = arith.constant 0 : index
    %c0_16 = arith.constant 0 : index
    %40 = vector.load %arg10[%c0_14, %c0_15, %c0_16] : memref<2x8x32xf32, #tpu.memory_space<vmem>>, vector<2x1x32xf32>
    %41 = vector.shape_cast %40 : vector<2x1x32xf32> to vector<2x32xf32>
    %42 = vector.shape_cast %39 : vector<2x32xf32> to vector<2x1x32xf32>
    tpu.vector_store %arg10[%c0_14, %c0_15, %c0_16], %42 {strides = array<i32>} : memref<2x8x32xf32, #tpu.memory_space<vmem>>, vector<2x1x32xf32>,
    %43 = vector.extract_strided_slice %8 {offsets = [0, 1, 0], sizes = [2, 1, 128], strides = [1, 1, 1]} : vector<2x8x128xf32> to vector<2x1x128xf32>
    %44 = vector.shape_cast %43 : vector<2x1x128xf32> to vector<2x128xf32>
    %cst_17 = arith.constant dense<0.000000e+00> : vector<2x128xf32>
    %45 = tpu.matmul %39, %1, %cst_17 {dimension_numbers = #tpu.dot_dimension_numbers<[1], [0], [0], [1], [0, 0, 1, 1], [], []>} : vector<2x32xf32>, vector<32x128xf32>, vector<2x128xf32> -> vector<2x128xf32>
    %46 = arith.addf %44, %45 : vector<2x128xf32>
    %47 = vector.extract_strided_slice %46 {offsets = [0, 0], sizes = [2, 32], strides = [1, 1]} : vector<2x128xf32> to vector<2x32xf32>
    %48 = arith.negf %47 : vector<2x32xf32>
    %49 = math.exp %48 : vector<2x32xf32>
    %cst_18 = arith.constant 1.000000e+00 : f32
    %50 = vector.broadcast %cst_18 : f32 to vector<2x32xf32>
    %51 = arith.addf %50, %49 : vector<2x32xf32>
    %52 = arith.divf %50, %51 : vector<2x32xf32>
    %53 = vector.extract_strided_slice %46 {offsets = [0, 32], sizes = [2, 32], strides = [1, 1]} : vector<2x128xf32> to vector<2x32xf32>
    %54 = arith.negf %53 : vector<2x32xf32>
    %55 = math.exp %54 : vector<2x32xf32>
    %cst_19 = arith.constant 1.000000e+00 : f32
    %56 = vector.broadcast %cst_19 : f32 to vector<2x32xf32>
    %57 = arith.addf %56, %55 : vector<2x32xf32>
    %58 = arith.divf %56, %57 : vector<2x32xf32>
    %59 = vector.extract_strided_slice %46 {offsets = [0, 64], sizes = [2, 32], strides = [1, 1]} : vector<2x128xf32> to vector<2x32xf32>
    %60 = math.tanh %59 : vector<2x32xf32>
    %61 = vector.extract_strided_slice %46 {offsets = [0, 96], sizes = [2, 32], strides = [1, 1]} : vector<2x128xf32> to vector<2x32xf32>
    %62 = arith.negf %61 : vector<2x32xf32>
    %63 = math.exp %62 : vector<2x32xf32>
    %cst_20 = arith.constant 1.000000e+00 : f32
    %64 = vector.broadcast %cst_20 : f32 to vector<2x32xf32>
    %65 = arith.addf %64, %63 : vector<2x32xf32>
    %66 = arith.divf %64, %65 : vector<2x32xf32>
    %67 = arith.mulf %58, %37 : vector<2x32xf32>
    %68 = arith.mulf %52, %60 : vector<2x32xf32>
    %69 = arith.addf %67, %68 : vector<2x32xf32>
    %70 = math.tanh %69 : vector<2x32xf32>
    %71 = arith.mulf %66, %70 : vector<2x32xf32>
    %c0_21 = arith.constant 0 : index
    %c1 = arith.constant 1 : index
    %c0_22 = arith.constant 0 : index
    %72 = vector.load %arg10[%c0_21, %c1, %c0_22] : memref<2x8x32xf32, #tpu.memory_space<vmem>>, vector<2x1x32xf32>
    %73 = vector.shape_cast %72 : vector<2x1x32xf32> to vector<2x32xf32>
    %74 = vector.shape_cast %71 : vector<2x32xf32> to vector<2x1x32xf32>
    tpu.vector_store %arg10[%c0_21, %c1, %c0_22], %74 {strides = array<i32>} : memref<2x8x32xf32, #tpu.memory_space<vmem>>, vector<2x1x32xf32>,
    %75 = vector.extract_strided_slice %8 {offsets = [0, 2, 0], sizes = [2, 1, 128], strides = [1, 1, 1]} : vector<2x8x128xf32> to vector<2x1x128xf32>
    %76 = vector.shape_cast %75 : vector<2x1x128xf32> to vector<2x128xf32>
    %cst_23 = arith.constant dense<0.000000e+00> : vector<2x128xf32>
    %77 = tpu.matmul %71, %1, %cst_23 {dimension_numbers = #tpu.dot_dimension_numbers<[1], [0], [0], [1], [0, 0, 1, 1], [], []>} : vector<2x32xf32>, vector<32x128xf32>, vector<2x128xf32> -> vector<2x128xf32>
    %78 = arith.addf %76, %77 : vector<2x128xf32>
    %79 = vector.extract_strided_slice %78 {offsets = [0, 0], sizes = [2, 32], strides = [1, 1]} : vector<2x128xf32> to vector<2x32xf32>
    %80 = arith.negf %79 : vector<2x32xf32>
    %81 = math.exp %80 : vector<2x32xf32>
    %cst_24 = arith.constant 1.000000e+00 : f32
    %82 = vector.broadcast %cst_24 : f32 to vector<2x32xf32>
    %83 = arith.addf %82, %81 : vector<2x32xf32>
    %84 = arith.divf %82, %83 : vector<2x32xf32>
    %85 = vector.extract_strided_slice %78 {offsets = [0, 32], sizes = [2, 32], strides = [1, 1]} : vector<2x128xf32> to vector<2x32xf32>
    %86 = arith.negf %85 : vector<2x32xf32>
    %87 = math.exp %86 : vector<2x32xf32>
    %cst_25 = arith.constant 1.000000e+00 : f32
    %88 = vector.broadcast %cst_25 : f32 to vector<2x32xf32>
    %89 = arith.addf %88, %87 : vector<2x32xf32>
    %90 = arith.divf %88, %89 : vector<2x32xf32>
    %91 = vector.extract_strided_slice %78 {offsets = [0, 64], sizes = [2, 32], strides = [1, 1]} : vector<2x128xf32> to vector<2x32xf32>
    %92 = math.tanh %91 : vector<2x32xf32>
    %93 = vector.extract_strided_slice %78 {offsets = [0, 96], sizes = [2, 32], strides = [1, 1]} : vector<2x128xf32> to vector<2x32xf32>
    %94 = arith.negf %93 : vector<2x32xf32>
    %95 = math.exp %94 : vector<2x32xf32>
    %cst_26 = arith.constant 1.000000e+00 : f32
    %96 = vector.broadcast %cst_26 : f32 to vector<2x32xf32>
    %97 = arith.addf %96, %95 : vector<2x32xf32>
    %98 = arith.divf %96, %97 : vector<2x32xf32>
    %99 = arith.mulf %90, %69 : vector<2x32xf32>
    %100 = arith.mulf %84, %92 : vector<2x32xf32>
    %101 = arith.addf %99, %100 : vector<2x32xf32>
    %102 = math.tanh %101 : vector<2x32xf32>
    %103 = arith.mulf %98, %102 : vector<2x32xf32>
    %c0_27 = arith.constant 0 : index
    %c2 = arith.constant 2 : index
    %c0_28 = arith.constant 0 : index
    %104 = vector.load %arg10[%c0_27, %c2, %c0_28] : memref<2x8x32xf32, #tpu.memory_space<vmem>>, vector<2x1x32xf32>
    %105 = vector.shape_cast %104 : vector<2x1x32xf32> to vector<2x32xf32>
    %106 = vector.shape_cast %103 : vector<2x32xf32> to vector<2x1x32xf32>
    tpu.vector_store %arg10[%c0_27, %c2, %c0_28], %106 {strides = array<i32>} : memref<2x8x32xf32, #tpu.memory_space<vmem>>, vector<2x1x32xf32>,
    %107 = vector.extract_strided_slice %8 {offsets = [0, 3, 0], sizes = [2, 1, 128], strides = [1, 1, 1]} : vector<2x8x128xf32> to vector<2x1x128xf32>
    %108 = vector.shape_cast %107 : vector<2x1x128xf32> to vector<2x128xf32>
    %cst_29 = arith.constant dense<0.000000e+00> : vector<2x128xf32>
    %109 = tpu.matmul %103, %1, %cst_29 {dimension_numbers = #tpu.dot_dimension_numbers<[1], [0], [0], [1], [0, 0, 1, 1], [], []>} : vector<2x32xf32>, vector<32x128xf32>, vector<2x128xf32> -> vector<2x128xf32>
    %110 = arith.addf %108, %109 : vector<2x128xf32>
    %111 = vector.extract_strided_slice %110 {offsets = [0, 0], sizes = [2, 32], strides = [1, 1]} : vector<2x128xf32> to vector<2x32xf32>
    %112 = arith.negf %111 : vector<2x32xf32>
    %113 = math.exp %112 : vector<2x32xf32>
    %cst_30 = arith.constant 1.000000e+00 : f32
    %114 = vector.broadcast %cst_30 : f32 to vector<2x32xf32>
    %115 = arith.addf %114, %113 : vector<2x32xf32>
    %116 = arith.divf %114, %115 : vector<2x32xf32>
    %117 = vector.extract_strided_slice %110 {offsets = [0, 32], sizes = [2, 32], strides = [1, 1]} : vector<2x128xf32> to vector<2x32xf32>
    %118 = arith.negf %117 : vector<2x32xf32>
    %119 = math.exp %118 : vector<2x32xf32>
    %cst_31 = arith.constant 1.000000e+00 : f32
    %120 = vector.broadcast %cst_31 : f32 to vector<2x32xf32>
    %121 = arith.addf %120, %119 : vector<2x32xf32>
    %122 = arith.divf %120, %121 : vector<2x32xf32>
    %123 = vector.extract_strided_slice %110 {offsets = [0, 64], sizes = [2, 32], strides = [1, 1]} : vector<2x128xf32> to vector<2x32xf32>
    %124 = math.tanh %123 : vector<2x32xf32>
    %125 = vector.extract_strided_slice %110 {offsets = [0, 96], sizes = [2, 32], strides = [1, 1]} : vector<2x128xf32> to vector<2x32xf32>
    %126 = arith.negf %125 : vector<2x32xf32>
    %127 = math.exp %126 : vector<2x32xf32>
    %cst_32 = arith.constant 1.000000e+00 : f32
    %128 = vector.broadcast %cst_32 : f32 to vector<2x32xf32>
    %129 = arith.addf %128, %127 : vector<2x32xf32>
    %130 = arith.divf %128, %129 : vector<2x32xf32>
    %131 = arith.mulf %122, %101 : vector<2x32xf32>
    %132 = arith.mulf %116, %124 : vector<2x32xf32>
    %133 = arith.addf %131, %132 : vector<2x32xf32>
    %134 = math.tanh %133 : vector<2x32xf32>
    %135 = arith.mulf %130, %134 : vector<2x32xf32>
    %c0_33 = arith.constant 0 : index
    %c3 = arith.constant 3 : index
    %c0_34 = arith.constant 0 : index
    %136 = vector.load %arg10[%c0_33, %c3, %c0_34] : memref<2x8x32xf32, #tpu.memory_space<vmem>>, vector<2x1x32xf32>
    %137 = vector.shape_cast %136 : vector<2x1x32xf32> to vector<2x32xf32>
    %138 = vector.shape_cast %135 : vector<2x32xf32> to vector<2x1x32xf32>
    tpu.vector_store %arg10[%c0_33, %c3, %c0_34], %138 {strides = array<i32>} : memref<2x8x32xf32, #tpu.memory_space<vmem>>, vector<2x1x32xf32>,
    %139 = vector.extract_strided_slice %8 {offsets = [0, 4, 0], sizes = [2, 1, 128], strides = [1, 1, 1]} : vector<2x8x128xf32> to vector<2x1x128xf32>
    %140 = vector.shape_cast %139 : vector<2x1x128xf32> to vector<2x128xf32>
    %cst_35 = arith.constant dense<0.000000e+00> : vector<2x128xf32>
    %141 = tpu.matmul %135, %1, %cst_35 {dimension_numbers = #tpu.dot_dimension_numbers<[1], [0], [0], [1], [0, 0, 1, 1], [], []>} : vector<2x32xf32>, vector<32x128xf32>, vector<2x128xf32> -> vector<2x128xf32>
    %142 = arith.addf %140, %141 : vector<2x128xf32>
    %143 = vector.extract_strided_slice %142 {offsets = [0, 0], sizes = [2, 32], strides = [1, 1]} : vector<2x128xf32> to vector<2x32xf32>
    %144 = arith.negf %143 : vector<2x32xf32>
    %145 = math.exp %144 : vector<2x32xf32>
    %cst_36 = arith.constant 1.000000e+00 : f32
    %146 = vector.broadcast %cst_36 : f32 to vector<2x32xf32>
    %147 = arith.addf %146, %145 : vector<2x32xf32>
    %148 = arith.divf %146, %147 : vector<2x32xf32>
    %149 = vector.extract_strided_slice %142 {offsets = [0, 32], sizes = [2, 32], strides = [1, 1]} : vector<2x128xf32> to vector<2x32xf32>
    %150 = arith.negf %149 : vector<2x32xf32>
    %151 = math.exp %150 : vector<2x32xf32>
    %cst_37 = arith.constant 1.000000e+00 : f32
    %152 = vector.broadcast %cst_37 : f32 to vector<2x32xf32>
    %153 = arith.addf %152, %151 : vector<2x32xf32>
    %154 = arith.divf %152, %153 : vector<2x32xf32>
    %155 = vector.extract_strided_slice %142 {offsets = [0, 64], sizes = [2, 32], strides = [1, 1]} : vector<2x128xf32> to vector<2x32xf32>
    %156 = math.tanh %155 : vector<2x32xf32>
    %157 = vector.extract_strided_slice %142 {offsets = [0, 96], sizes = [2, 32], strides = [1, 1]} : vector<2x128xf32> to vector<2x32xf32>
    %158 = arith.negf %157 : vector<2x32xf32>
    %159 = math.exp %158 : vector<2x32xf32>
    %cst_38 = arith.constant 1.000000e+00 : f32
    %160 = vector.broadcast %cst_38 : f32 to vector<2x32xf32>
    %161 = arith.addf %160, %159 : vector<2x32xf32>
    %162 = arith.divf %160, %161 : vector<2x32xf32>
    %163 = arith.mulf %154, %133 : vector<2x32xf32>
    %164 = arith.mulf %148, %156 : vector<2x32xf32>
    %165 = arith.addf %163, %164 : vector<2x32xf32>
    %166 = math.tanh %165 : vector<2x32xf32>
    %167 = arith.mulf %162, %166 : vector<2x32xf32>
    %c0_39 = arith.constant 0 : index
    %c4 = arith.constant 4 : index
    %c0_40 = arith.constant 0 : index
    %168 = vector.load %arg10[%c0_39, %c4, %c0_40] : memref<2x8x32xf32, #tpu.memory_space<vmem>>, vector<2x1x32xf32>
    %169 = vector.shape_cast %168 : vector<2x1x32xf32> to vector<2x32xf32>
    %170 = vector.shape_cast %167 : vector<2x32xf32> to vector<2x1x32xf32>
    tpu.vector_store %arg10[%c0_39, %c4, %c0_40], %170 {strides = array<i32>} : memref<2x8x32xf32, #tpu.memory_space<vmem>>, vector<2x1x32xf32>,
    %171 = vector.extract_strided_slice %8 {offsets = [0, 5, 0], sizes = [2, 1, 128], strides = [1, 1, 1]} : vector<2x8x128xf32> to vector<2x1x128xf32>
    %172 = vector.shape_cast %171 : vector<2x1x128xf32> to vector<2x128xf32>
    %cst_41 = arith.constant dense<0.000000e+00> : vector<2x128xf32>
    %173 = tpu.matmul %167, %1, %cst_41 {dimension_numbers = #tpu.dot_dimension_numbers<[1], [0], [0], [1], [0, 0, 1, 1], [], []>} : vector<2x32xf32>, vector<32x128xf32>, vector<2x128xf32> -> vector<2x128xf32>
    %174 = arith.addf %172, %173 : vector<2x128xf32>
    %175 = vector.extract_strided_slice %174 {offsets = [0, 0], sizes = [2, 32], strides = [1, 1]} : vector<2x128xf32> to vector<2x32xf32>
    %176 = arith.negf %175 : vector<2x32xf32>
    %177 = math.exp %176 : vector<2x32xf32>
    %cst_42 = arith.constant 1.000000e+00 : f32
    %178 = vector.broadcast %cst_42 : f32 to vector<2x32xf32>
    %179 = arith.addf %178, %177 : vector<2x32xf32>
    %180 = arith.divf %178, %179 : vector<2x32xf32>
    %181 = vector.extract_strided_slice %174 {offsets = [0, 32], sizes = [2, 32], strides = [1, 1]} : vector<2x128xf32> to vector<2x32xf32>
    %182 = arith.negf %181 : vector<2x32xf32>
    %183 = math.exp %182 : vector<2x32xf32>
    %cst_43 = arith.constant 1.000000e+00 : f32
    %184 = vector.broadcast %cst_43 : f32 to vector<2x32xf32>
    %185 = arith.addf %184, %183 : vector<2x32xf32>
    %186 = arith.divf %184, %185 : vector<2x32xf32>
    %187 = vector.extract_strided_slice %174 {offsets = [0, 64], sizes = [2, 32], strides = [1, 1]} : vector<2x128xf32> to vector<2x32xf32>
    %188 = math.tanh %187 : vector<2x32xf32>
    %189 = vector.extract_strided_slice %174 {offsets = [0, 96], sizes = [2, 32], strides = [1, 1]} : vector<2x128xf32> to vector<2x32xf32>
    %190 = arith.negf %189 : vector<2x32xf32>
    %191 = math.exp %190 : vector<2x32xf32>
    %cst_44 = arith.constant 1.000000e+00 : f32
    %192 = vector.broadcast %cst_44 : f32 to vector<2x32xf32>
    %193 = arith.addf %192, %191 : vector<2x32xf32>
    %194 = arith.divf %192, %193 : vector<2x32xf32>
    %195 = arith.mulf %186, %165 : vector<2x32xf32>
    %196 = arith.mulf %180, %188 : vector<2x32xf32>
    %197 = arith.addf %195, %196 : vector<2x32xf32>
    %198 = math.tanh %197 : vector<2x32xf32>
    %199 = arith.mulf %194, %198 : vector<2x32xf32>
    %c0_45 = arith.constant 0 : index
    %c5 = arith.constant 5 : index
    %c0_46 = arith.constant 0 : index
    %200 = vector.load %arg10[%c0_45, %c5, %c0_46] : memref<2x8x32xf32, #tpu.memory_space<vmem>>, vector<2x1x32xf32>
    %201 = vector.shape_cast %200 : vector<2x1x32xf32> to vector<2x32xf32>
    %202 = vector.shape_cast %199 : vector<2x32xf32> to vector<2x1x32xf32>
    tpu.vector_store %arg10[%c0_45, %c5, %c0_46], %202 {strides = array<i32>} : memref<2x8x32xf32, #tpu.memory_space<vmem>>, vector<2x1x32xf32>,
    %203 = vector.extract_strided_slice %8 {offsets = [0, 6, 0], sizes = [2, 1, 128], strides = [1, 1, 1]} : vector<2x8x128xf32> to vector<2x1x128xf32>
    %204 = vector.shape_cast %203 : vector<2x1x128xf32> to vector<2x128xf32>
    %cst_47 = arith.constant dense<0.000000e+00> : vector<2x128xf32>
    %205 = tpu.matmul %199, %1, %cst_47 {dimension_numbers = #tpu.dot_dimension_numbers<[1], [0], [0], [1], [0, 0, 1, 1], [], []>} : vector<2x32xf32>, vector<32x128xf32>, vector<2x128xf32> -> vector<2x128xf32>
    %206 = arith.addf %204, %205 : vector<2x128xf32>
    %207 = vector.extract_strided_slice %206 {offsets = [0, 0], sizes = [2, 32], strides = [1, 1]} : vector<2x128xf32> to vector<2x32xf32>
    %208 = arith.negf %207 : vector<2x32xf32>
    %209 = math.exp %208 : vector<2x32xf32>
    %cst_48 = arith.constant 1.000000e+00 : f32
    %210 = vector.broadcast %cst_48 : f32 to vector<2x32xf32>
    %211 = arith.addf %210, %209 : vector<2x32xf32>
    %212 = arith.divf %210, %211 : vector<2x32xf32>
    %213 = vector.extract_strided_slice %206 {offsets = [0, 32], sizes = [2, 32], strides = [1, 1]} : vector<2x128xf32> to vector<2x32xf32>
    %214 = arith.negf %213 : vector<2x32xf32>
    %215 = math.exp %214 : vector<2x32xf32>
    %cst_49 = arith.constant 1.000000e+00 : f32
    %216 = vector.broadcast %cst_49 : f32 to vector<2x32xf32>
    %217 = arith.addf %216, %215 : vector<2x32xf32>
    %218 = arith.divf %216, %217 : vector<2x32xf32>
    %219 = vector.extract_strided_slice %206 {offsets = [0, 64], sizes = [2, 32], strides = [1, 1]} : vector<2x128xf32> to vector<2x32xf32>
    %220 = math.tanh %219 : vector<2x32xf32>
    %221 = vector.extract_strided_slice %206 {offsets = [0, 96], sizes = [2, 32], strides = [1, 1]} : vector<2x128xf32> to vector<2x32xf32>
    %222 = arith.negf %221 : vector<2x32xf32>
    %223 = math.exp %222 : vector<2x32xf32>
    %cst_50 = arith.constant 1.000000e+00 : f32
    %224 = vector.broadcast %cst_50 : f32 to vector<2x32xf32>
    %225 = arith.addf %224, %223 : vector<2x32xf32>
    %226 = arith.divf %224, %225 : vector<2x32xf32>
    %227 = arith.mulf %218, %197 : vector<2x32xf32>
    %228 = arith.mulf %212, %220 : vector<2x32xf32>
    %229 = arith.addf %227, %228 : vector<2x32xf32>
    %230 = math.tanh %229 : vector<2x32xf32>
    %231 = arith.mulf %226, %230 : vector<2x32xf32>
    %c0_51 = arith.constant 0 : index
    %c6 = arith.constant 6 : index
    %c0_52 = arith.constant 0 : index
    %232 = vector.load %arg10[%c0_51, %c6, %c0_52] : memref<2x8x32xf32, #tpu.memory_space<vmem>>, vector<2x1x32xf32>
    %233 = vector.shape_cast %232 : vector<2x1x32xf32> to vector<2x32xf32>
    %234 = vector.shape_cast %231 : vector<2x32xf32> to vector<2x1x32xf32>
    tpu.vector_store %arg10[%c0_51, %c6, %c0_52], %234 {strides = array<i32>} : memref<2x8x32xf32, #tpu.memory_space<vmem>>, vector<2x1x32xf32>,
    %235 = vector.extract_strided_slice %8 {offsets = [0, 7, 0], sizes = [2, 1, 128], strides = [1, 1, 1]} : vector<2x8x128xf32> to vector<2x1x128xf32>
    %236 = vector.shape_cast %235 : vector<2x1x128xf32> to vector<2x128xf32>
    %cst_53 = arith.constant dense<0.000000e+00> : vector<2x128xf32>
    %237 = tpu.matmul %231, %1, %cst_53 {dimension_numbers = #tpu.dot_dimension_numbers<[1], [0], [0], [1], [0, 0, 1, 1], [], []>} : vector<2x32xf32>, vector<32x128xf32>, vector<2x128xf32> -> vector<2x128xf32>
    %238 = arith.addf %236, %237 : vector<2x128xf32>
    %239 = vector.extract_strided_slice %238 {offsets = [0, 0], sizes = [2, 32], strides = [1, 1]} : vector<2x128xf32> to vector<2x32xf32>
    %240 = arith.negf %239 : vector<2x32xf32>
    %241 = math.exp %240 : vector<2x32xf32>
    %cst_54 = arith.constant 1.000000e+00 : f32
    %242 = vector.broadcast %cst_54 : f32 to vector<2x32xf32>
    %243 = arith.addf %242, %241 : vector<2x32xf32>
    %244 = arith.divf %242, %243 : vector<2x32xf32>
    %245 = vector.extract_strided_slice %238 {offsets = [0, 32], sizes = [2, 32], strides = [1, 1]} : vector<2x128xf32> to vector<2x32xf32>
    %246 = arith.negf %245 : vector<2x32xf32>
    %247 = math.exp %246 : vector<2x32xf32>
    %cst_55 = arith.constant 1.000000e+00 : f32
    %248 = vector.broadcast %cst_55 : f32 to vector<2x32xf32>
    %249 = arith.addf %248, %247 : vector<2x32xf32>
    %250 = arith.divf %248, %249 : vector<2x32xf32>
    %251 = vector.extract_strided_slice %238 {offsets = [0, 64], sizes = [2, 32], strides = [1, 1]} : vector<2x128xf32> to vector<2x32xf32>
    %252 = math.tanh %251 : vector<2x32xf32>
    %253 = vector.extract_strided_slice %238 {offsets = [0, 96], sizes = [2, 32], strides = [1, 1]} : vector<2x128xf32> to vector<2x32xf32>
    %254 = arith.negf %253 : vector<2x32xf32>
    %255 = math.exp %254 : vector<2x32xf32>
    %cst_56 = arith.constant 1.000000e+00 : f32
    %256 = vector.broadcast %cst_56 : f32 to vector<2x32xf32>
    %257 = arith.addf %256, %255 : vector<2x32xf32>
    %258 = arith.divf %256, %257 : vector<2x32xf32>
    %259 = arith.mulf %250, %229 : vector<2x32xf32>
    %260 = arith.mulf %244, %252 : vector<2x32xf32>
    %261 = arith.addf %259, %260 : vector<2x32xf32>
    %262 = math.tanh %261 : vector<2x32xf32>
    %263 = arith.mulf %258, %262 : vector<2x32xf32>
    %c0_57 = arith.constant 0 : index
    %c7 = arith.constant 7 : index
    %c0_58 = arith.constant 0 : index
    %264 = vector.load %arg10[%c0_57, %c7, %c0_58] : memref<2x8x32xf32, #tpu.memory_space<vmem>>, vector<2x1x32xf32>
    %265 = vector.shape_cast %264 : vector<2x1x32xf32> to vector<2x32xf32>
    %266 = vector.shape_cast %263 : vector<2x32xf32> to vector<2x1x32xf32>
    tpu.vector_store %arg10[%c0_57, %c7, %c0_58], %266 {strides = array<i32>} : memref<2x8x32xf32, #tpu.memory_space<vmem>>, vector<2x1x32xf32>,
    %c0_59 = arith.constant 0 : index
    %c0_60 = arith.constant 0 : index
    %267 = vector.load %arg4[%c0_59, %c0_60] : memref<32x128xf32, #tpu.memory_space<vmem>>, vector<32x128xf32>
    %c0_61 = arith.constant 0 : index
    %c0_62 = arith.constant 0 : index
    %268 = vector.load %arg5[%c0_61, %c0_62] : memref<32x128xf32, #tpu.memory_space<vmem>>, vector<32x128xf32>
    %c0_63 = arith.constant 0 : index
    %c0_64 = arith.constant 0 : index
    %269 = vector.load %arg6[%c0_63, %c0_64] : memref<1x128xf32, #tpu.memory_space<vmem>>, vector<1x128xf32>
    %c0_65 = arith.constant 0 : index
    %c0_66 = arith.constant 0 : index
    %c0_67 = arith.constant 0 : index
    %270 = vector.load %arg10[%c0_65, %c0_66, %c0_67] : memref<2x8x32xf32, #tpu.memory_space<vmem>>, vector<2x8x32xf32>
    %271 = vector.shape_cast %270 : vector<2x8x32xf32> to vector<16x32xf32>
    %cst_68 = arith.constant dense<0.000000e+00> : vector<16x128xf32>
    %272 = tpu.matmul %271, %267, %cst_68 {dimension_numbers = #tpu.dot_dimension_numbers<[1], [0], [0], [1], [0, 0, 1, 1], [], []>} : vector<16x32xf32>, vector<32x128xf32>, vector<16x128xf32> -> vector<16x128xf32>
    %273 = vector.broadcast %269 : vector<1x128xf32> to vector<16x128xf32>
    %274 = arith.addf %272, %273 : vector<16x128xf32>
    %275 = vector.shape_cast %274 : vector<16x128xf32> to vector<2x8x128xf32>
    %cst_69 = arith.constant 0.000000e+00 : f32
    %276 = vector.broadcast %cst_69 : f32 to vector<2x32xf32>
    %cst_70 = arith.constant 0.000000e+00 : f32
    %277 = vector.broadcast %cst_70 : f32 to vector<2x32xf32>
    %278 = vector.extract_strided_slice %275 {offsets = [0, 0, 0], sizes = [2, 1, 128], strides = [1, 1, 1]} : vector<2x8x128xf32> to vector<2x1x128xf32>
    %279 = vector.shape_cast %278 : vector<2x1x128xf32> to vector<2x128xf32>
    %cst_71 = arith.constant dense<0.000000e+00> : vector<2x128xf32>
    %280 = tpu.matmul %276, %268, %cst_71 {dimension_numbers = #tpu.dot_dimension_numbers<[1], [0], [0], [1], [0, 0, 1, 1], [], []>} : vector<2x32xf32>, vector<32x128xf32>, vector<2x128xf32> -> vector<2x128xf32>
    %281 = arith.addf %279, %280 : vector<2x128xf32>
    %282 = vector.extract_strided_slice %281 {offsets = [0, 0], sizes = [2, 32], strides = [1, 1]} : vector<2x128xf32> to vector<2x32xf32>
    %283 = arith.negf %282 : vector<2x32xf32>
    %284 = math.exp %283 : vector<2x32xf32>
    %cst_72 = arith.constant 1.000000e+00 : f32
    %285 = vector.broadcast %cst_72 : f32 to vector<2x32xf32>
    %286 = arith.addf %285, %284 : vector<2x32xf32>
    %287 = arith.divf %285, %286 : vector<2x32xf32>
    %288 = vector.extract_strided_slice %281 {offsets = [0, 32], sizes = [2, 32], strides = [1, 1]} : vector<2x128xf32> to vector<2x32xf32>
    %289 = arith.negf %288 : vector<2x32xf32>
    %290 = math.exp %289 : vector<2x32xf32>
    %cst_73 = arith.constant 1.000000e+00 : f32
    %291 = vector.broadcast %cst_73 : f32 to vector<2x32xf32>
    %292 = arith.addf %291, %290 : vector<2x32xf32>
    %293 = arith.divf %291, %292 : vector<2x32xf32>
    %294 = vector.extract_strided_slice %281 {offsets = [0, 64], sizes = [2, 32], strides = [1, 1]} : vector<2x128xf32> to vector<2x32xf32>
    %295 = math.tanh %294 : vector<2x32xf32>
    %296 = vector.extract_strided_slice %281 {offsets = [0, 96], sizes = [2, 32], strides = [1, 1]} : vector<2x128xf32> to vector<2x32xf32>
    %297 = arith.negf %296 : vector<2x32xf32>
    %298 = math.exp %297 : vector<2x32xf32>
    %cst_74 = arith.constant 1.000000e+00 : f32
    %299 = vector.broadcast %cst_74 : f32 to vector<2x32xf32>
    %300 = arith.addf %299, %298 : vector<2x32xf32>
    %301 = arith.divf %299, %300 : vector<2x32xf32>
    %302 = arith.mulf %293, %277 : vector<2x32xf32>
    %303 = arith.mulf %287, %295 : vector<2x32xf32>
    %304 = arith.addf %302, %303 : vector<2x32xf32>
    %305 = math.tanh %304 : vector<2x32xf32>
    %306 = arith.mulf %301, %305 : vector<2x32xf32>
    %307 = vector.extract_strided_slice %275 {offsets = [0, 1, 0], sizes = [2, 1, 128], strides = [1, 1, 1]} : vector<2x8x128xf32> to vector<2x1x128xf32>
    %308 = vector.shape_cast %307 : vector<2x1x128xf32> to vector<2x128xf32>
    %cst_75 = arith.constant dense<0.000000e+00> : vector<2x128xf32>
    %309 = tpu.matmul %306, %268, %cst_75 {dimension_numbers = #tpu.dot_dimension_numbers<[1], [0], [0], [1], [0, 0, 1, 1], [], []>} : vector<2x32xf32>, vector<32x128xf32>, vector<2x128xf32> -> vector<2x128xf32>
    %310 = arith.addf %308, %309 : vector<2x128xf32>
    %311 = vector.extract_strided_slice %310 {offsets = [0, 0], sizes = [2, 32], strides = [1, 1]} : vector<2x128xf32> to vector<2x32xf32>
    %312 = arith.negf %311 : vector<2x32xf32>
    %313 = math.exp %312 : vector<2x32xf32>
    %cst_76 = arith.constant 1.000000e+00 : f32
    %314 = vector.broadcast %cst_76 : f32 to vector<2x32xf32>
    %315 = arith.addf %314, %313 : vector<2x32xf32>
    %316 = arith.divf %314, %315 : vector<2x32xf32>
    %317 = vector.extract_strided_slice %310 {offsets = [0, 32], sizes = [2, 32], strides = [1, 1]} : vector<2x128xf32> to vector<2x32xf32>
    %318 = arith.negf %317 : vector<2x32xf32>
    %319 = math.exp %318 : vector<2x32xf32>
    %cst_77 = arith.constant 1.000000e+00 : f32
    %320 = vector.broadcast %cst_77 : f32 to vector<2x32xf32>
    %321 = arith.addf %320, %319 : vector<2x32xf32>
    %322 = arith.divf %320, %321 : vector<2x32xf32>
    %323 = vector.extract_strided_slice %310 {offsets = [0, 64], sizes = [2, 32], strides = [1, 1]} : vector<2x128xf32> to vector<2x32xf32>
    %324 = math.tanh %323 : vector<2x32xf32>
    %325 = vector.extract_strided_slice %310 {offsets = [0, 96], sizes = [2, 32], strides = [1, 1]} : vector<2x128xf32> to vector<2x32xf32>
    %326 = arith.negf %325 : vector<2x32xf32>
    %327 = math.exp %326 : vector<2x32xf32>
    %cst_78 = arith.constant 1.000000e+00 : f32
    %328 = vector.broadcast %cst_78 : f32 to vector<2x32xf32>
    %329 = arith.addf %328, %327 : vector<2x32xf32>
    %330 = arith.divf %328, %329 : vector<2x32xf32>
    %331 = arith.mulf %322, %304 : vector<2x32xf32>
    %332 = arith.mulf %316, %324 : vector<2x32xf32>
    %333 = arith.addf %331, %332 : vector<2x32xf32>
    %334 = math.tanh %333 : vector<2x32xf32>
    %335 = arith.mulf %330, %334 : vector<2x32xf32>
    %336 = vector.extract_strided_slice %275 {offsets = [0, 2, 0], sizes = [2, 1, 128], strides = [1, 1, 1]} : vector<2x8x128xf32> to vector<2x1x128xf32>
    %337 = vector.shape_cast %336 : vector<2x1x128xf32> to vector<2x128xf32>
    %cst_79 = arith.constant dense<0.000000e+00> : vector<2x128xf32>
    %338 = tpu.matmul %335, %268, %cst_79 {dimension_numbers = #tpu.dot_dimension_numbers<[1], [0], [0], [1], [0, 0, 1, 1], [], []>} : vector<2x32xf32>, vector<32x128xf32>, vector<2x128xf32> -> vector<2x128xf32>
    %339 = arith.addf %337, %338 : vector<2x128xf32>
    %340 = vector.extract_strided_slice %339 {offsets = [0, 0], sizes = [2, 32], strides = [1, 1]} : vector<2x128xf32> to vector<2x32xf32>
    %341 = arith.negf %340 : vector<2x32xf32>
    %342 = math.exp %341 : vector<2x32xf32>
    %cst_80 = arith.constant 1.000000e+00 : f32
    %343 = vector.broadcast %cst_80 : f32 to vector<2x32xf32>
    %344 = arith.addf %343, %342 : vector<2x32xf32>
    %345 = arith.divf %343, %344 : vector<2x32xf32>
    %346 = vector.extract_strided_slice %339 {offsets = [0, 32], sizes = [2, 32], strides = [1, 1]} : vector<2x128xf32> to vector<2x32xf32>
    %347 = arith.negf %346 : vector<2x32xf32>
    %348 = math.exp %347 : vector<2x32xf32>
    %cst_81 = arith.constant 1.000000e+00 : f32
    %349 = vector.broadcast %cst_81 : f32 to vector<2x32xf32>
    %350 = arith.addf %349, %348 : vector<2x32xf32>
    %351 = arith.divf %349, %350 : vector<2x32xf32>
    %352 = vector.extract_strided_slice %339 {offsets = [0, 64], sizes = [2, 32], strides = [1, 1]} : vector<2x128xf32> to vector<2x32xf32>
    %353 = math.tanh %352 : vector<2x32xf32>
    %354 = vector.extract_strided_slice %339 {offsets = [0, 96], sizes = [2, 32], strides = [1, 1]} : vector<2x128xf32> to vector<2x32xf32>
    %355 = arith.negf %354 : vector<2x32xf32>
    %356 = math.exp %355 : vector<2x32xf32>
    %cst_82 = arith.constant 1.000000e+00 : f32
    %357 = vector.broadcast %cst_82 : f32 to vector<2x32xf32>
    %358 = arith.addf %357, %356 : vector<2x32xf32>
    %359 = arith.divf %357, %358 : vector<2x32xf32>
    %360 = arith.mulf %351, %333 : vector<2x32xf32>
    %361 = arith.mulf %345, %353 : vector<2x32xf32>
    %362 = arith.addf %360, %361 : vector<2x32xf32>
    %363 = math.tanh %362 : vector<2x32xf32>
    %364 = arith.mulf %359, %363 : vector<2x32xf32>
    %365 = vector.extract_strided_slice %275 {offsets = [0, 3, 0], sizes = [2, 1, 128], strides = [1, 1, 1]} : vector<2x8x128xf32> to vector<2x1x128xf32>
    %366 = vector.shape_cast %365 : vector<2x1x128xf32> to vector<2x128xf32>
    %cst_83 = arith.constant dense<0.000000e+00> : vector<2x128xf32>
    %367 = tpu.matmul %364, %268, %cst_83 {dimension_numbers = #tpu.dot_dimension_numbers<[1], [0], [0], [1], [0, 0, 1, 1], [], []>} : vector<2x32xf32>, vector<32x128xf32>, vector<2x128xf32> -> vector<2x128xf32>
    %368 = arith.addf %366, %367 : vector<2x128xf32>
    %369 = vector.extract_strided_slice %368 {offsets = [0, 0], sizes = [2, 32], strides = [1, 1]} : vector<2x128xf32> to vector<2x32xf32>
    %370 = arith.negf %369 : vector<2x32xf32>
    %371 = math.exp %370 : vector<2x32xf32>
    %cst_84 = arith.constant 1.000000e+00 : f32
    %372 = vector.broadcast %cst_84 : f32 to vector<2x32xf32>
    %373 = arith.addf %372, %371 : vector<2x32xf32>
    %374 = arith.divf %372, %373 : vector<2x32xf32>
    %375 = vector.extract_strided_slice %368 {offsets = [0, 32], sizes = [2, 32], strides = [1, 1]} : vector<2x128xf32> to vector<2x32xf32>
    %376 = arith.negf %375 : vector<2x32xf32>
    %377 = math.exp %376 : vector<2x32xf32>
    %cst_85 = arith.constant 1.000000e+00 : f32
    %378 = vector.broadcast %cst_85 : f32 to vector<2x32xf32>
    %379 = arith.addf %378, %377 : vector<2x32xf32>
    %380 = arith.divf %378, %379 : vector<2x32xf32>
    %381 = vector.extract_strided_slice %368 {offsets = [0, 64], sizes = [2, 32], strides = [1, 1]} : vector<2x128xf32> to vector<2x32xf32>
    %382 = math.tanh %381 : vector<2x32xf32>
    %383 = vector.extract_strided_slice %368 {offsets = [0, 96], sizes = [2, 32], strides = [1, 1]} : vector<2x128xf32> to vector<2x32xf32>
    %384 = arith.negf %383 : vector<2x32xf32>
    %385 = math.exp %384 : vector<2x32xf32>
    %cst_86 = arith.constant 1.000000e+00 : f32
    %386 = vector.broadcast %cst_86 : f32 to vector<2x32xf32>
    %387 = arith.addf %386, %385 : vector<2x32xf32>
    %388 = arith.divf %386, %387 : vector<2x32xf32>
    %389 = arith.mulf %380, %362 : vector<2x32xf32>
    %390 = arith.mulf %374, %382 : vector<2x32xf32>
    %391 = arith.addf %389, %390 : vector<2x32xf32>
    %392 = math.tanh %391 : vector<2x32xf32>
    %393 = arith.mulf %388, %392 : vector<2x32xf32>
    %394 = vector.extract_strided_slice %275 {offsets = [0, 4, 0], sizes = [2, 1, 128], strides = [1, 1, 1]} : vector<2x8x128xf32> to vector<2x1x128xf32>
    %395 = vector.shape_cast %394 : vector<2x1x128xf32> to vector<2x128xf32>
    %cst_87 = arith.constant dense<0.000000e+00> : vector<2x128xf32>
    %396 = tpu.matmul %393, %268, %cst_87 {dimension_numbers = #tpu.dot_dimension_numbers<[1], [0], [0], [1], [0, 0, 1, 1], [], []>} : vector<2x32xf32>, vector<32x128xf32>, vector<2x128xf32> -> vector<2x128xf32>
    %397 = arith.addf %395, %396 : vector<2x128xf32>
    %398 = vector.extract_strided_slice %397 {offsets = [0, 0], sizes = [2, 32], strides = [1, 1]} : vector<2x128xf32> to vector<2x32xf32>
    %399 = arith.negf %398 : vector<2x32xf32>
    %400 = math.exp %399 : vector<2x32xf32>
    %cst_88 = arith.constant 1.000000e+00 : f32
    %401 = vector.broadcast %cst_88 : f32 to vector<2x32xf32>
    %402 = arith.addf %401, %400 : vector<2x32xf32>
    %403 = arith.divf %401, %402 : vector<2x32xf32>
    %404 = vector.extract_strided_slice %397 {offsets = [0, 32], sizes = [2, 32], strides = [1, 1]} : vector<2x128xf32> to vector<2x32xf32>
    %405 = arith.negf %404 : vector<2x32xf32>
    %406 = math.exp %405 : vector<2x32xf32>
    %cst_89 = arith.constant 1.000000e+00 : f32
    %407 = vector.broadcast %cst_89 : f32 to vector<2x32xf32>
    %408 = arith.addf %407, %406 : vector<2x32xf32>
    %409 = arith.divf %407, %408 : vector<2x32xf32>
    %410 = vector.extract_strided_slice %397 {offsets = [0, 64], sizes = [2, 32], strides = [1, 1]} : vector<2x128xf32> to vector<2x32xf32>
    %411 = math.tanh %410 : vector<2x32xf32>
    %412 = vector.extract_strided_slice %397 {offsets = [0, 96], sizes = [2, 32], strides = [1, 1]} : vector<2x128xf32> to vector<2x32xf32>
    %413 = arith.negf %412 : vector<2x32xf32>
    %414 = math.exp %413 : vector<2x32xf32>
    %cst_90 = arith.constant 1.000000e+00 : f32
    %415 = vector.broadcast %cst_90 : f32 to vector<2x32xf32>
    %416 = arith.addf %415, %414 : vector<2x32xf32>
    %417 = arith.divf %415, %416 : vector<2x32xf32>
    %418 = arith.mulf %409, %391 : vector<2x32xf32>
    %419 = arith.mulf %403, %411 : vector<2x32xf32>
    %420 = arith.addf %418, %419 : vector<2x32xf32>
    %421 = math.tanh %420 : vector<2x32xf32>
    %422 = arith.mulf %417, %421 : vector<2x32xf32>
    %423 = vector.extract_strided_slice %275 {offsets = [0, 5, 0], sizes = [2, 1, 128], strides = [1, 1, 1]} : vector<2x8x128xf32> to vector<2x1x128xf32>
    %424 = vector.shape_cast %423 : vector<2x1x128xf32> to vector<2x128xf32>
    %cst_91 = arith.constant dense<0.000000e+00> : vector<2x128xf32>
    %425 = tpu.matmul %422, %268, %cst_91 {dimension_numbers = #tpu.dot_dimension_numbers<[1], [0], [0], [1], [0, 0, 1, 1], [], []>} : vector<2x32xf32>, vector<32x128xf32>, vector<2x128xf32> -> vector<2x128xf32>
    %426 = arith.addf %424, %425 : vector<2x128xf32>
    %427 = vector.extract_strided_slice %426 {offsets = [0, 0], sizes = [2, 32], strides = [1, 1]} : vector<2x128xf32> to vector<2x32xf32>
    %428 = arith.negf %427 : vector<2x32xf32>
    %429 = math.exp %428 : vector<2x32xf32>
    %cst_92 = arith.constant 1.000000e+00 : f32
    %430 = vector.broadcast %cst_92 : f32 to vector<2x32xf32>
    %431 = arith.addf %430, %429 : vector<2x32xf32>
    %432 = arith.divf %430, %431 : vector<2x32xf32>
    %433 = vector.extract_strided_slice %426 {offsets = [0, 32], sizes = [2, 32], strides = [1, 1]} : vector<2x128xf32> to vector<2x32xf32>
    %434 = arith.negf %433 : vector<2x32xf32>
    %435 = math.exp %434 : vector<2x32xf32>
    %cst_93 = arith.constant 1.000000e+00 : f32
    %436 = vector.broadcast %cst_93 : f32 to vector<2x32xf32>
    %437 = arith.addf %436, %435 : vector<2x32xf32>
    %438 = arith.divf %436, %437 : vector<2x32xf32>
    %439 = vector.extract_strided_slice %426 {offsets = [0, 64], sizes = [2, 32], strides = [1, 1]} : vector<2x128xf32> to vector<2x32xf32>
    %440 = math.tanh %439 : vector<2x32xf32>
    %441 = vector.extract_strided_slice %426 {offsets = [0, 96], sizes = [2, 32], strides = [1, 1]} : vector<2x128xf32> to vector<2x32xf32>
    %442 = arith.negf %441 : vector<2x32xf32>
    %443 = math.exp %442 : vector<2x32xf32>
    %cst_94 = arith.constant 1.000000e+00 : f32
    %444 = vector.broadcast %cst_94 : f32 to vector<2x32xf32>
    %445 = arith.addf %444, %443 : vector<2x32xf32>
    %446 = arith.divf %444, %445 : vector<2x32xf32>
    %447 = arith.mulf %438, %420 : vector<2x32xf32>
    %448 = arith.mulf %432, %440 : vector<2x32xf32>
    %449 = arith.addf %447, %448 : vector<2x32xf32>
    %450 = math.tanh %449 : vector<2x32xf32>
    %451 = arith.mulf %446, %450 : vector<2x32xf32>
    %452 = vector.extract_strided_slice %275 {offsets = [0, 6, 0], sizes = [2, 1, 128], strides = [1, 1, 1]} : vector<2x8x128xf32> to vector<2x1x128xf32>
    %453 = vector.shape_cast %452 : vector<2x1x128xf32> to vector<2x128xf32>
    %cst_95 = arith.constant dense<0.000000e+00> : vector<2x128xf32>
    %454 = tpu.matmul %451, %268, %cst_95 {dimension_numbers = #tpu.dot_dimension_numbers<[1], [0], [0], [1], [0, 0, 1, 1], [], []>} : vector<2x32xf32>, vector<32x128xf32>, vector<2x128xf32> -> vector<2x128xf32>
    %455 = arith.addf %453, %454 : vector<2x128xf32>
    %456 = vector.extract_strided_slice %455 {offsets = [0, 0], sizes = [2, 32], strides = [1, 1]} : vector<2x128xf32> to vector<2x32xf32>
    %457 = arith.negf %456 : vector<2x32xf32>
    %458 = math.exp %457 : vector<2x32xf32>
    %cst_96 = arith.constant 1.000000e+00 : f32
    %459 = vector.broadcast %cst_96 : f32 to vector<2x32xf32>
    %460 = arith.addf %459, %458 : vector<2x32xf32>
    %461 = arith.divf %459, %460 : vector<2x32xf32>
    %462 = vector.extract_strided_slice %455 {offsets = [0, 32], sizes = [2, 32], strides = [1, 1]} : vector<2x128xf32> to vector<2x32xf32>
    %463 = arith.negf %462 : vector<2x32xf32>
    %464 = math.exp %463 : vector<2x32xf32>
    %cst_97 = arith.constant 1.000000e+00 : f32
    %465 = vector.broadcast %cst_97 : f32 to vector<2x32xf32>
    %466 = arith.addf %465, %464 : vector<2x32xf32>
    %467 = arith.divf %465, %466 : vector<2x32xf32>
    %468 = vector.extract_strided_slice %455 {offsets = [0, 64], sizes = [2, 32], strides = [1, 1]} : vector<2x128xf32> to vector<2x32xf32>
    %469 = math.tanh %468 : vector<2x32xf32>
    %470 = vector.extract_strided_slice %455 {offsets = [0, 96], sizes = [2, 32], strides = [1, 1]} : vector<2x128xf32> to vector<2x32xf32>
    %471 = arith.negf %470 : vector<2x32xf32>
    %472 = math.exp %471 : vector<2x32xf32>
    %cst_98 = arith.constant 1.000000e+00 : f32
    %473 = vector.broadcast %cst_98 : f32 to vector<2x32xf32>
    %474 = arith.addf %473, %472 : vector<2x32xf32>
    %475 = arith.divf %473, %474 : vector<2x32xf32>
    %476 = arith.mulf %467, %449 : vector<2x32xf32>
    %477 = arith.mulf %461, %469 : vector<2x32xf32>
    %478 = arith.addf %476, %477 : vector<2x32xf32>
    %479 = math.tanh %478 : vector<2x32xf32>
    %480 = arith.mulf %475, %479 : vector<2x32xf32>
    %481 = vector.extract_strided_slice %275 {offsets = [0, 7, 0], sizes = [2, 1, 128], strides = [1, 1, 1]} : vector<2x8x128xf32> to vector<2x1x128xf32>
    %482 = vector.shape_cast %481 : vector<2x1x128xf32> to vector<2x128xf32>
    %cst_99 = arith.constant dense<0.000000e+00> : vector<2x128xf32>
    %483 = tpu.matmul %480, %268, %cst_99 {dimension_numbers = #tpu.dot_dimension_numbers<[1], [0], [0], [1], [0, 0, 1, 1], [], []>} : vector<2x32xf32>, vector<32x128xf32>, vector<2x128xf32> -> vector<2x128xf32>
    %484 = arith.addf %482, %483 : vector<2x128xf32>
    %485 = vector.extract_strided_slice %484 {offsets = [0, 0], sizes = [2, 32], strides = [1, 1]} : vector<2x128xf32> to vector<2x32xf32>
    %486 = arith.negf %485 : vector<2x32xf32>
    %487 = math.exp %486 : vector<2x32xf32>
    %cst_100 = arith.constant 1.000000e+00 : f32
    %488 = vector.broadcast %cst_100 : f32 to vector<2x32xf32>
    %489 = arith.addf %488, %487 : vector<2x32xf32>
    %490 = arith.divf %488, %489 : vector<2x32xf32>
    %491 = vector.extract_strided_slice %484 {offsets = [0, 32], sizes = [2, 32], strides = [1, 1]} : vector<2x128xf32> to vector<2x32xf32>
    %492 = arith.negf %491 : vector<2x32xf32>
    %493 = math.exp %492 : vector<2x32xf32>
    %cst_101 = arith.constant 1.000000e+00 : f32
    %494 = vector.broadcast %cst_101 : f32 to vector<2x32xf32>
    %495 = arith.addf %494, %493 : vector<2x32xf32>
    %496 = arith.divf %494, %495 : vector<2x32xf32>
    %497 = vector.extract_strided_slice %484 {offsets = [0, 64], sizes = [2, 32], strides = [1, 1]} : vector<2x128xf32> to vector<2x32xf32>
    %498 = math.tanh %497 : vector<2x32xf32>
    %499 = vector.extract_strided_slice %484 {offsets = [0, 96], sizes = [2, 32], strides = [1, 1]} : vector<2x128xf32> to vector<2x32xf32>
    %500 = arith.negf %499 : vector<2x32xf32>
    %501 = math.exp %500 : vector<2x32xf32>
    %cst_102 = arith.constant 1.000000e+00 : f32
    %502 = vector.broadcast %cst_102 : f32 to vector<2x32xf32>
    %503 = arith.addf %502, %501 : vector<2x32xf32>
    %504 = arith.divf %502, %503 : vector<2x32xf32>
    %505 = arith.mulf %496, %478 : vector<2x32xf32>
    %506 = arith.mulf %490, %498 : vector<2x32xf32>
    %507 = arith.addf %505, %506 : vector<2x32xf32>
    %508 = math.tanh %507 : vector<2x32xf32>
    %509 = arith.mulf %504, %508 : vector<2x32xf32>
    %c0_103 = arith.constant 0 : index
    %c0_104 = arith.constant 0 : index
    %510 = vector.load %arg7[%c0_103, %c0_104] : memref<32x8xf32, #tpu.memory_space<vmem>>, vector<32x8xf32>
    %cst_105 = arith.constant dense<0.000000e+00> : vector<2x8xf32>
    %511 = tpu.matmul %509, %510, %cst_105 {dimension_numbers = #tpu.dot_dimension_numbers<[1], [0], [0], [1], [0, 0, 1, 1], [], []>} : vector<2x32xf32>, vector<32x8xf32>, vector<2x8xf32> -> vector<2x8xf32>
    %c0_106 = arith.constant 0 : index
    %c0_107 = arith.constant 0 : index
    %512 = vector.load %arg8[%c0_106, %c0_107] : memref<1x8xf32, #tpu.memory_space<vmem>>, vector<1x8xf32>
    %513 = vector.broadcast %512 : vector<1x8xf32> to vector<2x8xf32>
    %514 = arith.addf %511, %513 : vector<2x8xf32>
    %c0_108 = arith.constant 0 : index
    %c0_109 = arith.constant 0 : index
    %515 = vector.load %arg9[%c0_108, %c0_109] : memref<2x8xf32, #tpu.memory_space<vmem>>, vector<2x8xf32>
    tpu.vector_store %arg9[%c0_108, %c0_109], %514 {strides = array<i32>} : memref<2x8xf32, #tpu.memory_space<vmem>>, vector<2x8xf32>,
    return
  }
}

</mosaic_0001>

<bundles_post_ra>
// kernel: lstm_forward_pallas.1
= control target key start
LH: loop header
LB: loop body
LE: loop exit
PB: predicated region body
PF: predicated region fallthrough
CT: control target
= control target key end

     0   :  { %14 = vsyncpa [#allocation4], 0  ;;  %s3900_s0 = inlined_call_operand.vmem [shape: f32[2,8,4], index: 0, kind: input, shape index: {}]   ;;  %s3901_s1 = inlined_call_operand.hbm [shape: f32[4,128], index: 1, kind: input, shape index: {}]   ;;  %s3902_s2 = inlined_call_operand.vmem [shape: f32[32,128], index: 2, kind: input, shape index: {}]   ;;  %s3903_s3 = inlined_call_operand.vmem [shape: f32[1,128], index: 3, kind: input, shape index: {}]   ;;  %s3904_s4 = inlined_call_operand.vmem [shape: f32[32,128], index: 4, kind: input, shape index: {}]   ;;  %s3905_s5 = inlined_call_operand.hbm [shape: f32[32,128], index: 5, kind: input, shape index: {}]   ;;  %s3906_s6 = inlined_call_operand.vmem [shape: f32[1,128], index: 6, kind: input, shape index: {}]   ;;  %s3907_s7 = inlined_call_operand.vmem [shape: f32[32,8], index: 7, kind: input, shape index: {}]   ;;  %s3908_s8 = inlined_call_operand.hbm [shape: f32[1,8], index: 8, kind: input, shape index: {}]   ;;  %s3909_s9 = inlined_call_operand.vmem [shape: f32[2,8], index: 9, kind: output, shape index: {}]  }
   0x1   :  { %15 = vsyncpa [#allocation6], 0  ;;  %s3327_s30 = smov [#allocation5]  }
   0x2   :  { %s39_s10 = sshll.u32 %s3327_s30, 4  ;;  %s40_s10 = int_to_ptr.vmem [resolvable:$true] %s39_s10 }
   0x3   :  { %s3271_s11 = scalar_lea.vmem %s40_s10, 512  ;;  %p3276_p1 = scmp.lt.s32.totalorder %s40_s10, %s40_s10 }
   0x4   :  { %p3272_p0 = scmp.ne.s32.totalorder %s40_s10, %s3271_s11  ;;  %p3277_p2 = scmp.lt.s32.totalorder %s3271_s11, %s3271_s11 }
   0x6   :  { %p3278_p3 = por %p3277_p2, %p3276_p1 }
   0x8   :  { %p3279_p4 = pnand %p3278_p3, %p3272_p0 }
   0xa   :  { %3282 = shalt.err (!%p3279_p4)
}
   0xb   :  { %s3328_s12 = smov 128   ;;  %s3329_s13 = smov 8  }
   0xc   :  { %45 = dma.hbm_to_vmem [thread:$0]  %s3905_s5, 512, %s40_s10, [#allocation6], %s3328_s12, %s3328_s12, %s3329_s13  }
   0xd   :  { %s3330_s16 = smov [#allocation3]   ;;  %s3331_s18 = smov [#allocation7]  }
   0xe   :  { %s24_s17 = sshll.u32 %s3330_s16, 4  ;;  %s56_s19 = sshll.u32 %s3331_s18, 4  ;;  %s25_s17 = int_to_ptr.vmem [resolvable:$true] %s24_s17  ;;  %s57_s19 = int_to_ptr.vmem [resolvable:$true] %s56_s19 }
   0xf   :  { %s3291_s20 = scalar_lea.vmem %s25_s17, 64  ;;  %p3296_p6 = scmp.lt.s32.totalorder %s25_s17, %s25_s17 }
  0x10   :  { %p3292_p5 = scmp.ne.s32.totalorder %s25_s17, %s3291_s20  ;;  %p3297_p7 = scmp.lt.s32.totalorder %s3291_s20, %s3291_s20 }
  0x12   :  { %p3298_p8 = por %p3297_p7, %p3296_p6 }
  0x14   :  { %p3299_p9 = pnand %p3298_p8, %p3292_p5 }
  0x16   :  { %3302 = shalt.err (!%p3299_p9)
}
  0x17   :  { %27 = dma.hbm_to_vmem [thread:$0]  %s3901_s1, 64, %s25_s17, [#allocation4]  }
  0x18   :  { %s3311_s23 = scalar_lea.vmem %s57_s19, 16  ;;  %s3315_s5 = scalar_lea.vmem %s57_s19, 32 }
  0x19   :  { %p3312_p10 = scmp.ne.s32.totalorder %s57_s19, %s3311_s23  ;;  %p3316_p11 = scmp.lt.s32.totalorder %s57_s19, %s57_s19 }
  0x1a   :  { %p3317_p12 = scmp.lt.s32.totalorder %s3315_s5, %s3311_s23 }
  0x1c   :  { %p3318_p13 = por %p3317_p12, %p3316_p11 }
  0x1e   :  { %p3319_p0 = pnand %p3318_p13, %p3312_p10 }
  0x20   :  { %3322 = shalt.err (!%p3319_p0)
}
  0x21   :  { %59 = dma.hbm_to_vmem [thread:$0]  %s3908_s8, 16, %s57_s19, [#allocation6]  }
  0x22   :  { %3323 = dma.done.wait [#allocation4], 64  }
  0x23   :  { %3324 = vsyncadd [#allocation4], 4294967232 }
  0x24   :  { %3325 = dma.done.wait [#allocation6], 528  }
  0x25   :  { %3326 = vsyncadd [#allocation6], 4294966768  ;;  %v3332_v0 = vmov 0.0   ;;  %vm3333_vm0 = vmmov 0   ;;  %vm90_vm1 = vcmask 1043456   ;;  %v3401_v1 = vld [vmem:[%s3902_s2 + $0x18] sm:$0xff] }
  0x26   :  { %2800 = vmatprep.subr.mxu1 %v3332_v0  ;;  %2808 = vmatprep.mubr.msk.f32.mxu1 %vm3333_vm0, %v3332_v0  ;;  %v69_v2 = vld [vmem:[#allocation3] sm:$0xf]  ;;  %v75_v3 = vld [vmem:[%s3900_s0] sm:$0xff]  ;;  %vm83_vm2 = vcmask 31744   ;;  %v76_v5 = vld [vmem:[%s3900_s0 + $0x8] sm:$0xff]  ;;  %s3334_s15 = smov 64  }
  0x27   :  { %2801 = vmatpush3.msra.mxu1 %v3401_v1  ;;  %2795 = vmatprep.subr.msk.mxu0 %vm90_vm1, %v69_v2  ;;  %v3410_v4 = vld [vmem:[%s3902_s2 + $0x10] sm:$0xff]  ;;  %v3419_v6 = vld [vmem:[%s3902_s2 + $0x8] sm:$0xff]  ;;  %v3426_v7 = vld [vmem:[%s3902_s2] sm:$0xff]  ;;  %vm309_vm3 = vcmask 1041409   ;;  %vm169_vm4 = vcmask 261120   ;;  %vm305_vm5 = vcmask 253952  }
  0x28   :  { %2802 = vmatprep.subr.mxu1 %v3332_v0  ;;  %2796 = vmatpush3.msk.msra.mxu0 %vm90_vm1, %v69_v2  ;;  %v2646_v9 = vld [vmem:[%s3903_s3] ss:$0 sm:$0xff]  ;;  %s3335_s3 = smov 32   ;;  %vm453_vm6 = vcmask 254977   ;;  %vm601_vm7 = vcmask 256002   ;;  %vm750_vm8 = vcmask 257027  }
  0x29   :  { %2797 = vmatprep.mubr.msk.f32.mxu0 %vm83_vm2, %v75_v3  ;;  %2803 = vmatpush3.msra.mxu1 %v3410_v4  ;;  %vm899_vm9 = vcmask 258052   ;;  %vm1048_vm10 = vcmask 259077   ;;  %vm1197_vm11 = vcmask 260102   ;;  %vm1346_vm12 = vcmask 261127  }
  0x2a   :  { %2798 = vmatmul.mubr.msk.f32.vlgmr.msra.gmra.mxu0 %vm83_vm2, %v76_v5  ;;  %2804 = vmatprep.subr.mxu1 %v3332_v0  ;;  %vm2638_vm13 = vcmask 58368  }
  0x2b   :  { %2805 = vmatpush3.msra.mxu1 %v3419_v6  ;;  %2811 = vmatprep.subr.mxu0 %v3332_v0 }
  0x2c   :  { %2806 = vmatprep.subr.mxu1 %v3332_v0  ;;  %2812 = vmatpush3.msra.mxu0 %v3401_v1 }
  0x2d   :  { %2807 = vmatpush3.msra.mxu1 %v3426_v7  ;;  %2813 = vmatprep.subr.mxu0 %v3332_v0 }
  0x2e   :  { %2809 = vmatmul.mubr.f32.vlgmr.msra.gmra.mxu1 %v3332_v0  ;;  %2814 = vmatpush3.msra.mxu0 %v3410_v4 }
  0x2f   :  { %2815 = vmatprep.subr.mxu0 %v3332_v0  ;;  %2819 = vmatprep.mubr.msk.f32.mxu0 %vm3333_vm0, %v3332_v0 }
  0x30   :  { %2816 = vmatpush3.msra.mxu0 %v3419_v6  ;;  %2822 = vmatprep.subr.mxu1 %v3332_v0 }
  0x31   :  { %2817 = vmatprep.subr.mxu0 %v3332_v0  ;;  %2823 = vmatpush3.msra.mxu1 %v3401_v1 }
  0x32   :  { %2818 = vmatpush3.msra.mxu0 %v3426_v7  ;;  %2824 = vmatprep.subr.mxu1 %v3332_v0 }
  0x33   :  { %2825 = vmatpush3.msra.mxu1 %v3410_v4  ;;  %2830 = vmatprep.mubr.msk.f32.mxu1 %vm3333_vm0, %v3332_v0 }
  0x34   :  { %2826 = vmatprep.subr.mxu1 %v3332_v0  ;;  %2833 = vmatprep.subr.mxu0 %v3332_v0 }
  0x35   :  { %2827 = vmatpush3.msra.mxu1 %v3419_v6 }
  0x36   :  { %2828 = vmatprep.subr.mxu1 %v3332_v0 }
  0x37   :  { %2829 = vmatpush3.msra.mxu1 %v3426_v7 }
  0x38   :  { %2844 = vmatprep.subr.mxu1 %v3332_v0 }
  0xea   :  { %v2799_v8 = vpop.f32.mrf.mxu0 }
  0xeb   :  { %v3457_v10 = vadd.f32 %v2799_v8, %v2646_v9 }
  0xec   :  { %v160_v11 = vpop.f32.mrf.mxu0 }
  0xed   :  { %v3459_v14 = vadd.f32 %v2646_v9, %v160_v11 }
  0xee   :  { %v239_v12 = vpop.f32.mrf.mxu1 }
  0xef   :  { %v244_v13 = vrot.slane %v239_v12, 1  ;;  %v247_v17 = vadd.f32 %v239_v12, %v3459_v14 }
  0xf0   :  { %v2810_v15 = vpop.f32.mrf.mxu1 }
  0xf1   :  { %v248_v16 = vadd.f32 %v244_v13, %v3457_v10  ;;  %v2650_v21 = vmul.f32 -1.442695, %v247_v17 }
  0xf3   :  { %3007 = vtanh.f32 %v248_v16  ;;  %v2651_v20 = vmul.f32 -1.442695, %v248_v16 }
  0xf4   :  { %3009 = vtanh.f32 %v247_v17 }
  0xf5   :  { %3011 = vpow2.f32 %v2651_v20 }
  0xf6   :  { %3013 = vpow2.f32 %v2650_v21 }
 0x100   :  { %v3008_v18 = vpop.eup %3007 }
 0x101   :  { %269 = vrot.lane.b32.xlu0 %v3008_v18, %s3334_s15  ;;  %v3010_v19 = vpop.eup %3009 }
 0x102   :  { %v3012_v22 = vpop.eup %3011 }
 0x103   :  { %v256_v23 = vadd.f32 1.0, %v3012_v22  ;;  %v3014_v24 = vpop.eup %3013 }
 0x104   :  { %v255_v25 = vadd.f32 1.0, %v3014_v24 }
 0x105   :  { %267 = vrot.lane.b32.xlu0 %v3010_v19, %s3334_s15  ;;  %3015 = vrcp.f32 %v256_v23 }
 0x106   :  { %3017 = vrcp.f32 %v255_v25 }
 0x112   :  { %v3016_v26 = vpop.eup %3015 }
 0x113   :  { %v3018_v29 = vpop.eup %3017  ;;  %v264_v32 = vmul.f32 0.0, %v3016_v26 }
 0x114   :  { %v263_v35 = vmul.f32 0.0, %v3018_v29 }
 0x173   :  { %v270_v27 = vpop.permute.xlu0 %269 }
 0x174   :  { %v274_v28 = vmul.f32 %v3016_v26, %v270_v27 }
 0x176   :  { %279 = vrot.lane.b32.xlu1 %v274_v28, %s3335_s3 }
 0x177   :  { %v268_v30 = vpop.permute.xlu0 %267 }
 0x178   :  { %v273_v31 = vmul.f32 %v3018_v29, %v268_v30 }
 0x17a   :  { %277 = vrot.lane.b32.xlu1 %v273_v31, %s3335_s3 }
 0x1e8   :  { %v280_v33 = vpop.permute.xlu1 %279 }
 0x1e9   :  { %v284_v34 = vadd.f32 %v280_v33, %v264_v32 }
 0x1eb   :  { %3019 = vtanh.f32 %v284_v34  ;;  %v408_v5 = vrot.slane %v284_v34, 7 }
 0x1ec   :  { %v278_v36 = vpop.permute.xlu1 %277 }
 0x1ed   :  { %v283_v37 = vadd.f32 %v278_v36, %v263_v35 }
 0x1ef   :  { %3021 = vtanh.f32 %v283_v37  ;;  %v407_v9 = vrot.slane %v283_v37, 7 }
 0x1f8   :  { %v3020_v38 = vpop.eup %3019 }
 0x1f9   :  { %291 = vrot.lane.b32.xlu0 %v3020_v38, %s3334_s15 }
 0x1fc   :  { %v3022_v39 = vpop.eup %3021 }
 0x1fd   :  { %289 = vrot.lane.b32.xlu1 %v3022_v39, %s3334_s15 }
 0x26b   :  { %v292_v40 = vpop.permute.xlu0 %291 }
 0x26c   :  { %v3469_v41 = vmul.f32 %v3016_v26, %v292_v40 }
 0x26e   :  { %v308_v43 = vrot.slane %v3469_v41, 7 }
 0x26f   :  { %v290_v42 = vpop.permute.xlu1 %289 }
 0x270   :  { %v3472_v44 = vmul.f32 %v3018_v29, %v290_v42 }
 0x272   :  { %v310_v45 = vsel %vm309_vm3, %v308_v43, %v3472_v44 }
 0x273   :  { %311 = vrot.lane.b32.xlu0 %v310_v45, %s3335_s3 }
 0x2e5   :  { %v312_v46 = vpop.permute.xlu0 %311 }
 0x2e6   :  { %2820 = vmatmul.mubr.msk.f32.vlgmr.msra.gmra.mxu0 %vm169_vm4, %v312_v46 }
 0x2e7   :  { %2834 = vmatpush3.msra.mxu0 %v3401_v1  ;;  %2841 = vmatprep.mubr.msk.f32.mxu0 %vm3333_vm0, %v3332_v0 }
 0x2e8   :  { %2835 = vmatprep.subr.mxu0 %v3332_v0 }
 0x2e9   :  { %2836 = vmatpush3.msra.mxu0 %v3410_v4 }
 0x2ea   :  { %2837 = vmatprep.subr.mxu0 %v3332_v0 }
 0x2eb   :  { %2838 = vmatpush3.msra.mxu0 %v3419_v6 }
 0x2ec   :  { %2839 = vmatprep.subr.mxu0 %v3332_v0 }
 0x2ed   :  { %2840 = vmatpush3.msra.mxu0 %v3426_v7 }
 0x2ee   :  { %2855 = vmatprep.subr.mxu0 %v3332_v0 }
 0x3a6   :  { %v381_v47 = vpop.f32.mrf.mxu0 }
 0x3a7   :  { %v386_v48 = vrot.slane %v381_v47, 7  ;;  %v390_v49 = vadd.f32 %v381_v47, %v3457_v10 }
 0x3a8   :  { %v2821_v50 = vpop.f32.mrf.mxu0 }
 0x3a9   :  { %v389_v51 = vadd.f32 %v386_v48, %v3459_v14  ;;  %3023 = vtanh.f32 %v390_v49  ;;  %v2654_v54 = vmul.f32 -1.442695, %v390_v49 }
 0x3ab   :  { %3025 = vtanh.f32 %v389_v51  ;;  %v2653_v55 = vmul.f32 -1.442695, %v389_v51 }
 0x3ac   :  { %3027 = vpow2.f32 %v2654_v54 }
 0x3ad   :  { %3029 = vpow2.f32 %v2653_v55 }
 0x3b6   :  { %v3024_v52 = vpop.eup %3023 }
 0x3b7   :  { %417 = vrot.lane.b32.xlu0 %v3024_v52, %s3334_s15 }
 0x3b8   :  { %v3026_v53 = vpop.eup %3025 }
 0x3b9   :  { %415 = vrot.lane.b32.xlu1 %v3026_v53, %s3334_s15  ;;  %v3028_v56 = vpop.eup %3027 }
 0x3ba   :  { %v3030_v57 = vpop.eup %3029  ;;  %v398_v58 = vadd.f32 1.0, %v3028_v56 }
 0x3bb   :  { %v397_v59 = vadd.f32 1.0, %v3030_v57 }
 0x3bc   :  { %3031 = vrcp.f32 %v398_v58 }
 0x3bd   :  { %3033 = vrcp.f32 %v397_v59 }
 0x3c9   :  { %v3032_v60 = vpop.eup %3031 }
 0x3ca   :  { %v3034_v63 = vpop.eup %3033  ;;  %v412_v8 = vmul.f32 %v3032_v60, %v408_v5 }
 0x3cb   :  { %v411_v13 = vmul.f32 %v3034_v63, %v407_v9 }
 0x429   :  { %v418_v61 = vpop.permute.xlu0 %417 }
 0x42a   :  { %v422_v62 = vmul.f32 %v3032_v60, %v418_v61 }
 0x42b   :  { %v416_v2 = vpop.permute.xlu1 %415 }
 0x42c   :  { %427 = vrot.lane.b32.xlu0 %v422_v62, %s3335_s3  ;;  %v421_v3 = vmul.f32 %v3034_v63, %v416_v2 }
 0x42e   :  { %425 = vrot.lane.b32.xlu1 %v421_v3, %s3335_s3 }
 0x49e   :  { %v428_v11 = vpop.permute.xlu0 %427 }
 0x49f   :  { %v432_v12 = vadd.f32 %v428_v11, %v412_v8 }
 0x4a0   :  { %v426_v15 = vpop.permute.xlu1 %425 }
 0x4a1   :  { %3035 = vtanh.f32 %v432_v12  ;;  %v431_v16 = vadd.f32 %v426_v15, %v411_v13  ;;  %v556_v49 = vrot.slane %v432_v12, 7 }
 0x4a3   :  { %3037 = vtanh.f32 %v431_v16  ;;  %v555_v48 = vrot.slane %v431_v16, 7 }
 0x4ae   :  { %v3036_v17 = vpop.eup %3035 }
 0x4af   :  { %439 = vrot.lane.b32.xlu0 %v3036_v17, %s3334_s15 }
 0x4b0   :  { %v3038_v18 = vpop.eup %3037 }
 0x4b1   :  { %437 = vrot.lane.b32.xlu1 %v3038_v18, %s3334_s15 }
 0x521   :  { %v440_v19 = vpop.permute.xlu0 %439 }
 0x522   :  { %v3498_v22 = vmul.f32 %v3032_v60, %v440_v19 }
 0x523   :  { %v438_v20 = vpop.permute.xlu1 %437 }
 0x524   :  { %v3496_v21 = vmul.f32 %v3034_v63, %v438_v20 }
 0x526   :  { %v456_v23 = vrot.slane %v3496_v21, 1 }
 0x528   :  { %v457_v24 = vsel %vm309_vm3, %v3498_v22, %v456_v23 }
 0x529   :  { %458 = vrot.lane.b32.xlu1 %v457_v24, %s3335_s3 }
 0x59b   :  { %v459_v25 = vpop.permute.xlu1 %458 }
 0x59c   :  { %2831 = vmatmul.mubr.msk.f32.vlgmr.msra.gmra.mxu1 %vm169_vm4, %v459_v25 }
 0x59d   :  { %2845 = vmatpush3.msra.mxu1 %v3401_v1  ;;  %2852 = vmatprep.mubr.msk.f32.mxu1 %vm3333_vm0, %v3332_v0 }
 0x59e   :  { %2846 = vmatprep.subr.mxu1 %v3332_v0 }
 0x59f   :  { %2847 = vmatpush3.msra.mxu1 %v3410_v4 }
 0x5a0   :  { %2848 = vmatprep.subr.mxu1 %v3332_v0 }
 0x5a1   :  { %2849 = vmatpush3.msra.mxu1 %v3419_v6 }
 0x5a2   :  { %2850 = vmatprep.subr.mxu1 %v3332_v0 }
 0x5a3   :  { %2851 = vmatpush3.msra.mxu1 %v3426_v7 }
 0x5a4   :  { %2866 = vmatprep.subr.mxu1 %v3332_v0 }
 0x65c   :  { %v528_v26 = vpop.f32.mrf.mxu1 }
 0x65d   :  { %v533_v27 = vrot.slane %v528_v26, 6  ;;  %v534_v28 = vrot.slane %v528_v26, 7 }
 0x65e   :  { %v2832_v29 = vpop.f32.mrf.mxu1 }
 0x65f   :  { %v537_v30 = vadd.f32 %v533_v27, %v3459_v14  ;;  %v538_v31 = vadd.f32 %v534_v28, %v3457_v10 }
 0x661   :  { %3039 = vtanh.f32 %v537_v30  ;;  %v2656_v34 = vmul.f32 -1.442695, %v537_v30  ;;  %v2657_v35 = vmul.f32 -1.442695, %v538_v31 }
 0x662   :  { %3041 = vtanh.f32 %v538_v31 }
 0x663   :  { %3043 = vpow2.f32 %v2656_v34 }
 0x664   :  { %3045 = vpow2.f32 %v2657_v35 }
 0x66e   :  { %v3040_v32 = vpop.eup %3039 }
 0x66f   :  { %v3042_v33 = vpop.eup %3041  ;;  %563 = vrot.lane.b32.xlu0 %v3040_v32, %s3334_s15 }
 0x670   :  { %565 = vrot.lane.b32.xlu1 %v3042_v33, %s3334_s15  ;;  %v3044_v36 = vpop.eup %3043 }
 0x671   :  { %v3046_v37 = vpop.eup %3045  ;;  %v545_v38 = vadd.f32 1.0, %v3044_v36 }
 0x672   :  { %v546_v39 = vadd.f32 1.0, %v3046_v37 }
 0x673   :  { %3047 = vrcp.f32 %v545_v38 }
 0x674   :  { %3049 = vrcp.f32 %v546_v39 }
 0x680   :  { %v3048_v40 = vpop.eup %3047 }
 0x681   :  { %v3050_v43 = vpop.eup %3049  ;;  %v559_v50 = vmul.f32 %v3048_v40, %v555_v48 }
 0x682   :  { %v560_v51 = vmul.f32 %v3050_v43, %v556_v49 }
 0x6e1   :  { %v564_v42 = vpop.permute.xlu0 %563 }
 0x6e2   :  { %v566_v45 = vpop.permute.xlu1 %565  ;;  %v569_v46 = vmul.f32 %v3048_v40, %v564_v42 }
 0x6e3   :  { %v570_v47 = vmul.f32 %v3050_v43, %v566_v45 }
 0x6e4   :  { %573 = vrot.lane.b32.xlu0 %v569_v46, %s3335_s3 }
 0x6e5   :  { %575 = vrot.lane.b32.xlu1 %v570_v47, %s3335_s3 }
 0x756   :  { %v574_v52 = vpop.permute.xlu0 %573 }
 0x757   :  { %v576_v53 = vpop.permute.xlu1 %575  ;;  %v579_v54 = vadd.f32 %v574_v52, %v559_v50 }
 0x758   :  { %v580_v55 = vadd.f32 %v576_v53, %v560_v51 }
 0x759   :  { %3051 = vtanh.f32 %v579_v54  ;;  %v704_v31 = vrot.slane %v579_v54, 7 }
 0x75a   :  { %3053 = vtanh.f32 %v580_v55  ;;  %v705_v32 = vrot.slane %v580_v55, 7 }
 0x766   :  { %v3052_v56 = vpop.eup %3051 }
 0x767   :  { %v3054_v57 = vpop.eup %3053  ;;  %585 = vrot.lane.b32.xlu0 %v3052_v56, %s3334_s15 }
 0x768   :  { %587 = vrot.lane.b32.xlu1 %v3054_v57, %s3334_s15 }
 0x7d9   :  { %v586_v58 = vpop.permute.xlu0 %585 }
 0x7da   :  { %v588_v59 = vpop.permute.xlu1 %587  ;;  %v3523_v60 = vmul.f32 %v3048_v40, %v586_v58 }
 0x7db   :  { %v3525_v61 = vmul.f32 %v3050_v43, %v588_v59 }
 0x7dc   :  { %v604_v62 = vrot.slane %v3523_v60, 2 }
 0x7dd   :  { %v605_v63 = vrot.slane %v3525_v61, 1 }
 0x7df   :  { %v606_v2 = vsel %vm309_vm3, %v605_v63, %v604_v62 }
 0x7e0   :  { %607 = vrot.lane.b32.xlu0 %v606_v2, %s3335_s3 }
 0x852   :  { %v608_v3 = vpop.permute.xlu0 %607 }
 0x853   :  { %2842 = vmatmul.mubr.msk.f32.vlgmr.msra.gmra.mxu0 %vm169_vm4, %v608_v3 }
 0x854   :  { %2856 = vmatpush3.msra.mxu0 %v3401_v1  ;;  %2863 = vmatprep.mubr.msk.f32.mxu0 %vm3333_vm0, %v3332_v0 }
 0x855   :  { %2857 = vmatprep.subr.mxu0 %v3332_v0 }
 0x856   :  { %2858 = vmatpush3.msra.mxu0 %v3410_v4 }
 0x857   :  { %2859 = vmatprep.subr.mxu0 %v3332_v0 }
 0x858   :  { %2860 = vmatpush3.msra.mxu0 %v3419_v6 }
 0x859   :  { %2861 = vmatprep.subr.mxu0 %v3332_v0 }
 0x85a   :  { %2862 = vmatpush3.msra.mxu0 %v3426_v7 }
 0x85b   :  { %2877 = vmatprep.subr.mxu0 %v3332_v0 }
 0x913   :  { %v677_v5 = vpop.f32.mrf.mxu0 }
 0x914   :  { %v682_v8 = vrot.slane %v677_v5, 5  ;;  %v683_v9 = vrot.slane %v677_v5, 6 }
 0x915   :  { %v2843_v11 = vpop.f32.mrf.mxu0 }
 0x916   :  { %v686_v12 = vadd.f32 %v682_v8, %v3459_v14  ;;  %v687_v13 = vadd.f32 %v683_v9, %v3457_v10 }
 0x918   :  { %3055 = vtanh.f32 %v686_v12  ;;  %v2659_v17 = vmul.f32 -1.442695, %v686_v12  ;;  %v2660_v18 = vmul.f32 -1.442695, %v687_v13 }
 0x919   :  { %3057 = vtanh.f32 %v687_v13 }
 0x91a   :  { %3059 = vpow2.f32 %v2659_v17 }
 0x91b   :  { %3061 = vpow2.f32 %v2660_v18 }
 0x925   :  { %v3056_v15 = vpop.eup %3055 }
 0x926   :  { %v3058_v16 = vpop.eup %3057  ;;  %712 = vrot.lane.b32.xlu1 %v3056_v15, %s3334_s15 }
 0x927   :  { %714 = vrot.lane.b32.xlu0 %v3058_v16, %s3334_s15  ;;  %v3060_v19 = vpop.eup %3059 }
 0x928   :  { %v3062_v20 = vpop.eup %3061  ;;  %v694_v23 = vadd.f32 1.0, %v3060_v19 }
 0x929   :  { %v695_v24 = vadd.f32 1.0, %v3062_v20 }
 0x92a   :  { %3063 = vrcp.f32 %v694_v23 }
 0x92b   :  { %3065 = vrcp.f32 %v695_v24 }
 0x937   :  { %v3064_v25 = vpop.eup %3063 }
 0x938   :  { %v3066_v27 = vpop.eup %3065  ;;  %v708_v33 = vmul.f32 %v3064_v25, %v704_v31 }
 0x939   :  { %v709_v34 = vmul.f32 %v3066_v27, %v705_v32 }
 0x998   :  { %v713_v26 = vpop.permute.xlu1 %712 }
 0x999   :  { %v715_v28 = vpop.permute.xlu0 %714  ;;  %v718_v29 = vmul.f32 %v3064_v25, %v713_v26 }
 0x99a   :  { %v719_v30 = vmul.f32 %v3066_v27, %v715_v28 }
 0x99b   :  { %722 = vrot.lane.b32.xlu1 %v718_v29, %s3335_s3 }
 0x99c   :  { %724 = vrot.lane.b32.xlu0 %v719_v30, %s3335_s3 }
 0xa0d   :  { %v723_v35 = vpop.permute.xlu1 %722 }
 0xa0e   :  { %v725_v36 = vpop.permute.xlu0 %724  ;;  %v728_v37 = vadd.f32 %v723_v35, %v708_v33 }
 0xa0f   :  { %v729_v38 = vadd.f32 %v725_v36, %v709_v34 }
 0xa10   :  { %3067 = vtanh.f32 %v728_v37  ;;  %v853_v16 = vrot.slane %v728_v37, 7 }
 0xa11   :  { %3069 = vtanh.f32 %v729_v38  ;;  %v854_v17 = vrot.slane %v729_v38, 7 }
 0xa1d   :  { %v3068_v39 = vpop.eup %3067 }
 0xa1e   :  { %v3070_v40 = vpop.eup %3069  ;;  %734 = vrot.lane.b32.xlu1 %v3068_v39, %s3334_s15 }
 0xa1f   :  { %736 = vrot.lane.b32.xlu0 %v3070_v40, %s3334_s15 }
 0xa90   :  { %v735_v42 = vpop.permute.xlu1 %734 }
 0xa91   :  { %v737_v43 = vpop.permute.xlu0 %736  ;;  %v3550_v45 = vmul.f32 %v3064_v25, %v735_v42 }
 0xa92   :  { %v3552_v46 = vmul.f32 %v3066_v27, %v737_v43 }
 0xa93   :  { %v753_v47 = vrot.slane %v3550_v45, 3 }
 0xa94   :  { %v754_v48 = vrot.slane %v3552_v46, 2 }
 0xa96   :  { %v755_v49 = vsel %vm309_vm3, %v754_v48, %v753_v47 }
 0xa97   :  { %756 = vrot.lane.b32.xlu1 %v755_v49, %s3335_s3 }
 0xb09   :  { %v757_v50 = vpop.permute.xlu1 %756 }
 0xb0a   :  { %2853 = vmatmul.mubr.msk.f32.vlgmr.msra.gmra.mxu1 %vm169_vm4, %v757_v50 }
 0xb0b   :  { %2867 = vmatpush3.msra.mxu1 %v3401_v1  ;;  %2874 = vmatprep.mubr.msk.f32.mxu1 %vm3333_vm0, %v3332_v0 }
 0xb0c   :  { %2868 = vmatprep.subr.mxu1 %v3332_v0 }
 0xb0d   :  { %2869 = vmatpush3.msra.mxu1 %v3410_v4 }
 0xb0e   :  { %2870 = vmatprep.subr.mxu1 %v3332_v0 }
 0xb0f   :  { %2871 = vmatpush3.msra.mxu1 %v3419_v6 }
 0xb10   :  { %2872 = vmatprep.subr.mxu1 %v3332_v0 }
 0xb11   :  { %2873 = vmatpush3.msra.mxu1 %v3426_v7 }
 0xbca   :  { %v826_v51 = vpop.f32.mrf.mxu1 }
 0xbcb   :  { %v831_v52 = vrot.slane %v826_v51, 4  ;;  %v832_v53 = vrot.slane %v826_v51, 5 }
 0xbcc   :  { %v2854_v54 = vpop.f32.mrf.mxu1 }
 0xbcd   :  { %v835_v55 = vadd.f32 %v831_v52, %v3459_v14  ;;  %v836_v56 = vadd.f32 %v832_v53, %v3457_v10 }
 0xbcf   :  { %3071 = vtanh.f32 %v835_v55  ;;  %v2662_v59 = vmul.f32 -1.442695, %v835_v55  ;;  %v2663_v62 = vmul.f32 -1.442695, %v836_v56 }
 0xbd0   :  { %3073 = vtanh.f32 %v836_v56 }
 0xbd1   :  { %3075 = vpow2.f32 %v2662_v59 }
 0xbd2   :  { %3077 = vpow2.f32 %v2663_v62 }
 0xbdc   :  { %v3072_v57 = vpop.eup %3071 }
 0xbdd   :  { %v3074_v58 = vpop.eup %3073  ;;  %861 = vrot.lane.b32.xlu0 %v3072_v57, %s3334_s15 }
 0xbde   :  { %863 = vrot.lane.b32.xlu1 %v3074_v58, %s3334_s15  ;;  %v3076_v63 = vpop.eup %3075 }
 0xbdf   :  { %v3078_v2 = vpop.eup %3077  ;;  %v843_v3 = vadd.f32 1.0, %v3076_v63 }
 0xbe0   :  { %v844_v5 = vadd.f32 1.0, %v3078_v2 }
 0xbe1   :  { %3079 = vrcp.f32 %v843_v3 }
 0xbe2   :  { %3081 = vrcp.f32 %v844_v5 }
 0xbee   :  { %v3080_v8 = vpop.eup %3079 }
 0xbef   :  { %v3082_v11 = vpop.eup %3081  ;;  %v857_v18 = vmul.f32 %v3080_v8, %v853_v16 }
 0xbf0   :  { %v858_v19 = vmul.f32 %v3082_v11, %v854_v17 }
 0xc4f   :  { %v862_v9 = vpop.permute.xlu0 %861 }
 0xc50   :  { %v864_v12 = vpop.permute.xlu1 %863  ;;  %v867_v13 = vmul.f32 %v3080_v8, %v862_v9 }
 0xc51   :  { %v868_v15 = vmul.f32 %v3082_v11, %v864_v12 }
 0xc52   :  { %871 = vrot.lane.b32.xlu0 %v867_v13, %s3335_s3 }
 0xc53   :  { %873 = vrot.lane.b32.xlu1 %v868_v15, %s3335_s3 }
 0xcc4   :  { %v872_v20 = vpop.permute.xlu0 %871 }
 0xcc5   :  { %v874_v23 = vpop.permute.xlu1 %873  ;;  %v877_v24 = vadd.f32 %v872_v20, %v857_v18 }
 0xcc6   :  { %v878_v25 = vadd.f32 %v874_v23, %v858_v19 }
 0xcc7   :  { %3083 = vtanh.f32 %v877_v24  ;;  %v1002_v56 = vrot.slane %v877_v24, 7 }
 0xcc8   :  { %3085 = vtanh.f32 %v878_v25  ;;  %v1003_v57 = vrot.slane %v878_v25, 7 }
 0xcd4   :  { %v3084_v26 = vpop.eup %3083 }
 0xcd5   :  { %v3086_v27 = vpop.eup %3085  ;;  %883 = vrot.lane.b32.xlu0 %v3084_v26, %s3334_s15 }
 0xcd6   :  { %885 = vrot.lane.b32.xlu1 %v3086_v27, %s3334_s15 }
 0xd47   :  { %v884_v28 = vpop.permute.xlu0 %883 }
 0xd48   :  { %v886_v29 = vpop.permute.xlu1 %885  ;;  %v3576_v30 = vmul.f32 %v3080_v8, %v884_v28 }
 0xd49   :  { %v3578_v31 = vmul.f32 %v3082_v11, %v886_v29 }
 0xd4a   :  { %v902_v32 = vrot.slane %v3576_v30, 4 }
 0xd4b   :  { %v903_v33 = vrot.slane %v3578_v31, 3 }
 0xd4d   :  { %v904_v34 = vsel %vm309_vm3, %v903_v33, %v902_v32 }
 0xd4e   :  { %905 = vrot.lane.b32.xlu0 %v904_v34, %s3335_s3 }
 0xdc0   :  { %v906_v35 = vpop.permute.xlu0 %905 }
 0xdc1   :  { %2864 = vmatmul.mubr.msk.f32.vlgmr.msra.gmra.mxu0 %vm169_vm4, %v906_v35 }
 0xdc2   :  { %2878 = vmatpush3.msra.mxu0 %v3401_v1  ;;  %2885 = vmatprep.mubr.msk.f32.mxu0 %vm3333_vm0, %v3332_v0 }
 0xdc3   :  { %2879 = vmatprep.subr.mxu0 %v3332_v0 }
 0xdc4   :  { %2880 = vmatpush3.msra.mxu0 %v3410_v4 }
 0xdc5   :  { %2881 = vmatprep.subr.mxu0 %v3332_v0 }
 0xdc6   :  { %2882 = vmatpush3.msra.mxu0 %v3419_v6 }
 0xdc7   :  { %2883 = vmatprep.subr.mxu0 %v3332_v0 }
 0xdc8   :  { %2884 = vmatpush3.msra.mxu0 %v3426_v7 }
 0xdc9   :  { %2899 = vmatprep.subr.mxu0 %v3332_v0 }
 0xe81   :  { %v975_v36 = vpop.f32.mrf.mxu0 }
 0xe82   :  { %v980_v37 = vrot.slane %v975_v36, 3  ;;  %v981_v1 = vrot.slane %v975_v36, 4 }
 0xe83   :  { %v2865_v38 = vpop.f32.mrf.mxu0 }
 0xe84   :  { %v984_v39 = vadd.f32 %v980_v37, %v3459_v14  ;;  %v985_v40 = vadd.f32 %v981_v1, %v3457_v10 }
 0xe86   :  { %3087 = vtanh.f32 %v984_v39  ;;  %v2665_v6 = vmul.f32 -1.442695, %v984_v39  ;;  %v2666_v7 = vmul.f32 -1.442695, %v985_v40 }
 0xe87   :  { %3089 = vtanh.f32 %v985_v40 }
 0xe88   :  { %3091 = vpow2.f32 %v2665_v6 }
 0xe89   :  { %3093 = vpow2.f32 %v2666_v7 }
 0xe93   :  { %v3088_v4 = vpop.eup %3087 }
 0xe94   :  { %v3090_v42 = vpop.eup %3089  ;;  %1010 = vrot.lane.b32.xlu1 %v3088_v4, %s3334_s15 }
 0xe95   :  { %1012 = vrot.lane.b32.xlu0 %v3090_v42, %s3334_s15  ;;  %v3092_v43 = vpop.eup %3091 }
 0xe96   :  { %v3094_v47 = vpop.eup %3093  ;;  %v992_v48 = vadd.f32 1.0, %v3092_v43 }
 0xe97   :  { %v993_v49 = vadd.f32 1.0, %v3094_v47 }
 0xe98   :  { %3095 = vrcp.f32 %v992_v48 }
 0xe99   :  { %3097 = vrcp.f32 %v993_v49 }
 0xea5   :  { %v3096_v50 = vpop.eup %3095 }
 0xea6   :  { %v3098_v52 = vpop.eup %3097  ;;  %v1006_v58 = vmul.f32 %v3096_v50, %v1002_v56 }
 0xea7   :  { %v1007_v59 = vmul.f32 %v3098_v52, %v1003_v57 }
 0xf06   :  { %v1011_v51 = vpop.permute.xlu1 %1010 }
 0xf07   :  { %v1013_v53 = vpop.permute.xlu0 %1012  ;;  %v1016_v54 = vmul.f32 %v3096_v50, %v1011_v51 }
 0xf08   :  { %v1017_v55 = vmul.f32 %v3098_v52, %v1013_v53 }
 0xf09   :  { %1020 = vrot.lane.b32.xlu1 %v1016_v54, %s3335_s3 }
 0xf0a   :  { %1022 = vrot.lane.b32.xlu0 %v1017_v55, %s3335_s3 }
 0xf7b   :  { %v1021_v62 = vpop.permute.xlu1 %1020 }
 0xf7c   :  { %v1023_v63 = vpop.permute.xlu0 %1022  ;;  %v1026_v2 = vadd.f32 %v1021_v62, %v1006_v58 }
 0xf7d   :  { %v1027_v3 = vadd.f32 %v1023_v63, %v1007_v59 }
 0xf7e   :  { %3099 = vtanh.f32 %v1026_v2  ;;  %v1151_v42 = vrot.slane %v1026_v2, 7 }
 0xf7f   :  { %3101 = vtanh.f32 %v1027_v3  ;;  %v1152_v6 = vrot.slane %v1027_v3, 7 }
 0xf8b   :  { %v3100_v5 = vpop.eup %3099 }
 0xf8c   :  { %v3102_v8 = vpop.eup %3101  ;;  %1032 = vrot.lane.b32.xlu1 %v3100_v5, %s3334_s15 }
 0xf8d   :  { %1034 = vrot.lane.b32.xlu0 %v3102_v8, %s3334_s15 }
 0xffe   :  { %v1033_v9 = vpop.permute.xlu1 %1032 }
 0xfff   :  { %v1035_v11 = vpop.permute.xlu0 %1034  ;;  %v3603_v12 = vmul.f32 %v3096_v50, %v1033_v9 }
0x1000   :  { %v3605_v13 = vmul.f32 %v3098_v52, %v1035_v11 }
0x1001   :  { %v1051_v15 = vrot.slane %v3603_v12, 5 }
0x1002   :  { %v1052_v16 = vrot.slane %v3605_v13, 4 }
0x1004   :  { %v1053_v17 = vsel %vm309_vm3, %v1052_v16, %v1051_v15 }
0x1005   :  { %1054 = vrot.lane.b32.xlu1 %v1053_v17, %s3335_s3 }
0x1077   :  { %v1055_v18 = vpop.permute.xlu1 %1054 }
0x1078   :  { %2875 = vmatmul.mubr.msk.f32.vlgmr.msra.gmra.mxu1 %vm169_vm4, %v1055_v18 }
0x1138   :  { %v1124_v19 = vpop.f32.mrf.mxu1 }
0x1139   :  { %v1129_v20 = vrot.slane %v1124_v19, 2  ;;  %v1130_v23 = vrot.slane %v1124_v19, 3 }
0x113a   :  { %v2876_v24 = vpop.f32.mrf.mxu1 }
0x113b   :  { %v1133_v25 = vadd.f32 %v1129_v20, %v3459_v14  ;;  %v1134_v26 = vadd.f32 %v1130_v23, %v3457_v10 }
0x113d   :  { %3103 = vtanh.f32 %v1133_v25  ;;  %v2668_v29 = vmul.f32 -1.442695, %v1133_v25  ;;  %v2669_v32 = vmul.f32 -1.442695, %v1134_v26 }
0x113e   :  { %3105 = vtanh.f32 %v1134_v26 }
0x113f   :  { %3107 = vpow2.f32 %v2668_v29 }
0x1140   :  { %3109 = vpow2.f32 %v2669_v32 }
0x114a   :  { %v3104_v27 = vpop.eup %3103 }
0x114b   :  { %v3106_v28 = vpop.eup %3105  ;;  %1159 = vrot.lane.b32.xlu0 %v3104_v27, %s3334_s15 }
0x114c   :  { %1161 = vrot.lane.b32.xlu1 %v3106_v28, %s3334_s15  ;;  %v3108_v33 = vpop.eup %3107 }
0x114d   :  { %v3110_v34 = vpop.eup %3109  ;;  %v1141_v35 = vadd.f32 1.0, %v3108_v33 }
0x114e   :  { %v1142_v36 = vadd.f32 1.0, %v3110_v34 }
0x114f   :  { %3111 = vrcp.f32 %v1141_v35 }
0x1150   :  { %3113 = vrcp.f32 %v1142_v36 }
0x115c   :  { %v3112_v37 = vpop.eup %3111 }
0x115d   :  { %v3114_v38 = vpop.eup %3113  ;;  %v1155_v7 = vmul.f32 %v3112_v37, %v1151_v42 }
0x115e   :  { %v1156_v43 = vmul.f32 %v3114_v38, %v1152_v6 }
0x11bd   :  { %v1160_v1 = vpop.permute.xlu0 %1159 }
0x11be   :  { %v1162_v39 = vpop.permute.xlu1 %1161  ;;  %v1165_v40 = vmul.f32 %v3112_v37, %v1160_v1 }
0x11bf   :  { %v1166_v4 = vmul.f32 %v3114_v38, %v1162_v39 }
0x11c0   :  { %1169 = vrot.lane.b32.xlu0 %v1165_v40, %s3335_s3 }
0x11c1   :  { %1171 = vrot.lane.b32.xlu1 %v1166_v4, %s3335_s3 }
0x1232   :  { %v1170_v47 = vpop.permute.xlu0 %1169 }
0x1233   :  { %v1172_v48 = vpop.permute.xlu1 %1171  ;;  %v1175_v49 = vadd.f32 %v1170_v47, %v1155_v7 }
0x1234   :  { %v1176_v50 = vadd.f32 %v1172_v48, %v1156_v43 }
0x1235   :  { %3115 = vtanh.f32 %v1175_v49  ;;  %v1300_v28 = vrot.slane %v1175_v49, 7 }
0x1236   :  { %3117 = vtanh.f32 %v1176_v50  ;;  %v1301_v29 = vrot.slane %v1176_v50, 7 }
0x1242   :  { %v3116_v51 = vpop.eup %3115 }
0x1243   :  { %v3118_v52 = vpop.eup %3117  ;;  %1181 = vrot.lane.b32.xlu0 %v3116_v51, %s3334_s15 }
0x1244   :  { %1183 = vrot.lane.b32.xlu1 %v3118_v52, %s3334_s15 }
0x12b5   :  { %v1182_v53 = vpop.permute.xlu0 %1181 }
0x12b6   :  { %v1184_v54 = vpop.permute.xlu1 %1183  ;;  %v1187_v55 = vmul.f32 %v3112_v37, %v1182_v53 }
0x12b7   :  { %v3620_v56 = vmul.f32 %v3114_v38, %v1184_v54 }
0x12b8   :  { %v1200_v57 = vrot.slane %v1187_v55, 6 }
0x12b9   :  { %v1201_v58 = vrot.slane %v3620_v56, 5 }
0x12bb   :  { %v1202_v59 = vsel %vm309_vm3, %v1201_v58, %v1200_v57 }
0x12bc   :  { %1203 = vrot.lane.b32.xlu0 %v1202_v59, %s3335_s3 }
0x132e   :  { %v1204_v62 = vpop.permute.xlu0 %1203 }
0x132f   :  { %2886 = vmatmul.mubr.msk.f32.vlgmr.msra.gmra.mxu0 %vm169_vm4, %v1204_v62  ;;  %v2673_v62 = vld [vmem:[%s3906_s6] ss:$0 sm:$0xff] }
0x1330   :  { %2907 = vmatprep.mubr.msk.f32.mxu0 %vm3333_vm0, %v3332_v0 }
0x13ef   :  { %v1273_v63 = vpop.f32.mrf.mxu0 }
0x13f0   :  { %v1278_v2 = vrot.slane %v1273_v63, 1  ;;  %v1279_v3 = vrot.slane %v1273_v63, 2 }
0x13f1   :  { %v2887_v5 = vpop.f32.mrf.mxu0 }
0x13f2   :  { %v1282_v8 = vadd.f32 %v1278_v2, %v3459_v14  ;;  %v1283_v9 = vadd.f32 %v1279_v3, %v3457_v10 }
0x13f4   :  { %3119 = vtanh.f32 %v1282_v8  ;;  %v2671_v16 = vmul.f32 -1.442695, %v1282_v8  ;;  %v2672_v17 = vmul.f32 -1.442695, %v1283_v9 }
0x13f5   :  { %3121 = vtanh.f32 %v1283_v9 }
0x13f6   :  { %3123 = vpow2.f32 %v2671_v16 }
0x13f7   :  { %3125 = vpow2.f32 %v2672_v17 }
0x1401   :  { %v3120_v11 = vpop.eup %3119 }
0x1402   :  { %v3122_v15 = vpop.eup %3121  ;;  %1308 = vrot.lane.b32.xlu1 %v3120_v11, %s3334_s15 }
0x1403   :  { %1310 = vrot.lane.b32.xlu0 %v3122_v15, %s3334_s15  ;;  %v3124_v18 = vpop.eup %3123 }
0x1404   :  { %v3126_v19 = vpop.eup %3125  ;;  %v1290_v20 = vadd.f32 1.0, %v3124_v18 }
0x1405   :  { %v1291_v23 = vadd.f32 1.0, %v3126_v19 }
0x1406   :  { %3127 = vrcp.f32 %v1290_v20 }
0x1407   :  { %3129 = vrcp.f32 %v1291_v23 }
0x1413   :  { %v3128_v14 = vpop.eup %3127 }
0x1414   :  { %v3632_v24 = vpop.eup %3129  ;;  %v1304_v32 = vmul.f32 %v3128_v14, %v1300_v28 }
0x1415   :  { %v1305_v33 = vmul.f32 %v3632_v24, %v1301_v29 }
0x1474   :  { %v1309_v10 = vpop.permute.xlu1 %1308 }
0x1475   :  { %v1311_v25 = vpop.permute.xlu0 %1310  ;;  %v1314_v26 = vmul.f32 %v3128_v14, %v1309_v10 }
0x1476   :  { %v1315_v27 = vmul.f32 %v3632_v24, %v1311_v25 }
0x1477   :  { %1318 = vrot.lane.b32.xlu1 %v1314_v26, %s3335_s3 }
0x1478   :  { %1320 = vrot.lane.b32.xlu0 %v1315_v27, %s3335_s3 }
0x14e9   :  { %v1319_v34 = vpop.permute.xlu1 %1318 }
0x14ea   :  { %v1321_v35 = vpop.permute.xlu0 %1320  ;;  %v1324_v36 = vadd.f32 %v1319_v34, %v1304_v32 }
0x14eb   :  { %v1325_v37 = vadd.f32 %v1321_v35, %v1305_v33 }
0x14ec   :  { %3131 = vtanh.f32 %v1324_v36 }
0x14ed   :  { %3133 = vtanh.f32 %v1325_v37 }
0x14f9   :  { %v3132_v1 = vpop.eup %3131 }
0x14fa   :  { %v3134_v38 = vpop.eup %3133  ;;  %1330 = vrot.lane.b32.xlu1 %v3132_v1, %s3334_s15 }
0x14fb   :  { %1332 = vrot.lane.b32.xlu0 %v3134_v38, %s3334_s15 }
0x14fe   :  { %299 = vrot.lane.b32.xlu1 %v3472_v44, %s3335_s3  ;;  %v3667_v44 = vld [vmem:[#allocation5 + $0x18] sm:$0xff] }
0x14ff   :  { %447 = vrot.lane.b32.xlu0 %v3496_v21, %s3335_s3  ;;  %2900 = vmatpush3.msra.mxu0 %v3667_v44  ;;  %v3674_v21 = vld [vmem:[#allocation5 + $0x10] sm:$0xff] }
0x1500   :  { %2901 = vmatprep.subr.mxu0 %v3332_v0 }
0x1501   :  { %2902 = vmatpush3.msra.mxu0 %v3674_v21 }
0x1502   :  { %595 = vrot.lane.b32.xlu1 %v3523_v60, %s3335_s3  ;;  %v3680_v60 = vld [vmem:[#allocation5 + $0x8] sm:$0xff]  ;;  %2903 = vmatprep.subr.mxu0 %v3332_v0 }
0x1503   :  { %744 = vrot.lane.b32.xlu0 %v3550_v45, %s3335_s3  ;;  %2904 = vmatpush3.msra.mxu0 %v3680_v60  ;;  %v3688_v45 = vld [vmem:[#allocation5] sm:$0xff] }
0x1504   :  { %2905 = vmatprep.subr.mxu0 %v3332_v0 }
0x1505   :  { %2906 = vmatpush3.msra.mxu0 %v3688_v45 }
0x1506   :  { %893 = vrot.lane.b32.xlu1 %v3576_v30, %s3335_s3  ;;  %2908 = vmatmul.mubr.f32.vlgmr.msra.gmra.mxu0 %v3332_v0 }
0x1507   :  { %1042 = vrot.lane.b32.xlu0 %v3603_v12, %s3335_s3  ;;  %2921 = vmatprep.subr.mxu0 %v3332_v0 }
0x1508   :  { %2922 = vmatpush3.msra.mxu0 %v3667_v44  ;;  %2929 = vmatprep.mubr.msk.f32.mxu0 %vm3333_vm0, %v3332_v0 }
0x1509   :  { %2923 = vmatprep.subr.mxu0 %v3332_v0 }
0x150a   :  { %1191 = vrot.lane.b32.xlu1 %v1187_v55, %s3335_s3  ;;  %2924 = vmatpush3.msra.mxu0 %v3674_v21 }
0x150b   :  { %449 = vrot.lane.b32.xlu0 %v3498_v22, %s3335_s3  ;;  %v1351_v22 = vld [vmem:[%s3904_s4 + $0x10] sm:$0xff]  ;;  %2925 = vmatprep.subr.mxu0 %v3332_v0 }
0x150c   :  { %2926 = vmatpush3.msra.mxu0 %v3680_v60 }
0x150d   :  { %2927 = vmatprep.subr.mxu0 %v3332_v0 }
0x150e   :  { %301 = vrot.lane.b32.xlu1 %v3469_v41, %s3335_s3  ;;  %v1352_v41 = vld [vmem:[%s3904_s4 + $0x18] sm:$0xff]  ;;  %2928 = vmatpush3.msra.mxu0 %v3688_v45 }
0x150f   :  { %746 = vrot.lane.b32.xlu0 %v3552_v46, %s3335_s3  ;;  %2888 = vmatprep.subr.mxu1 %v1352_v41  ;;  %v1349_v46 = vld [vmem:[%s3904_s4] sm:$0xff] }
0x1510   :  { %2889 = vmatpush3.msra.mxu1 %v1352_v41  ;;  %2943 = vmatprep.subr.mxu0 %v3332_v0 }
0x1511   :  { %2890 = vmatprep.subr.mxu1 %v1351_v22 }
0x1512   :  { %597 = vrot.lane.b32.xlu1 %v3525_v61, %s3335_s3  ;;  %v1350_v61 = vld [vmem:[%s3904_s4 + $0x8] sm:$0xff]  ;;  %2891 = vmatpush3.msra.mxu1 %v1351_v22 }
0x1513   :  { %1044 = vrot.lane.b32.xlu0 %v3605_v13, %s3335_s3  ;;  %2892 = vmatprep.subr.mxu1 %v1350_v61 }
0x1514   :  { %2893 = vmatpush3.msra.mxu1 %v1350_v61 }
0x1515   :  { %2894 = vmatprep.subr.mxu1 %v1349_v46 }
0x1516   :  { %895 = vrot.lane.b32.xlu1 %v3578_v31, %s3335_s3  ;;  %2895 = vmatpush3.msra.mxu1 %v1349_v46 }
0x1517   :  { %2910 = vmatprep.subr.mxu1 %v3332_v0 }
0x151a   :  { %1193 = vrot.lane.b32.xlu1 %v3620_v56, %s3335_s3 }
0x156c   :  { %v1331_v30 = vpop.permute.xlu1 %1330 }
0x156d   :  { %v1333_v31 = vpop.permute.xlu0 %1332  ;;  %v1336_v12 = vmul.f32 %v3128_v14, %v1331_v30 }
0x156e   :  { %v1337_v39 = vmul.f32 %v3632_v24, %v1333_v31 }
0x156f   :  { %1340 = vrot.lane.b32.xlu0 %v1336_v12, %s3335_s3 }
0x1570   :  { %v300_v13 = vpop.permute.xlu1 %299 }
0x1571   :  { %v448_v40 = vpop.permute.xlu0 %447  ;;  %306 = vst.msk [vmem:[#allocation2] sm:$0x1] %vm305_vm5, %v300_v13 }
0x1572   :  { %454 = vst.msk [vmem:[#allocation2] sm:$0x2] %vm453_vm6, %v448_v40 }
0x1573   :  { %1342 = vrot.lane.b32.xlu0 %v1337_v39, %s3335_s3 }
0x1574   :  { %v596_v4 = vpop.permute.xlu1 %595 }
0x1575   :  { %v745_v42 = vpop.permute.xlu0 %744  ;;  %602 = vst.msk [vmem:[#allocation2] sm:$0x4] %vm601_vm7, %v596_v4 }
0x1576   :  { %751 = vst.msk [vmem:[#allocation2] sm:$0x8] %vm750_vm8, %v745_v42 }
0x1578   :  { %v894_v6 = vpop.permute.xlu1 %893 }
0x1579   :  { %v1043_v7 = vpop.permute.xlu0 %1042  ;;  %900 = vst.msk [vmem:[#allocation2] sm:$0x10] %vm899_vm9, %v894_v6 }
0x157a   :  { %1049 = vst.msk [vmem:[#allocation2] sm:$0x20] %vm1048_vm10, %v1043_v7 }
0x157c   :  { %v1192_v43 = vpop.permute.xlu1 %1191 }
0x157d   :  { %v450_v47 = vpop.permute.xlu0 %449  ;;  %1198 = vst.msk [vmem:[#allocation2] sm:$0x40] %vm1197_vm11, %v1192_v43 }
0x157e   :  { %455 = vst.msk [vmem:[#allocation2 + $0x8] sm:$0x2] %vm453_vm6, %v450_v47 }
0x1580   :  { %v302_v48 = vpop.permute.xlu1 %301 }
0x1581   :  { %v747_v49 = vpop.permute.xlu0 %746  ;;  %307 = vst.msk [vmem:[#allocation2 + $0x8] sm:$0x1] %vm305_vm5, %v302_v48 }
0x1582   :  { %752 = vst.msk [vmem:[#allocation2 + $0x8] sm:$0x8] %vm750_vm8, %v747_v49 }
0x1584   :  { %v598_v50 = vpop.permute.xlu1 %597 }
0x1585   :  { %v1045_v51 = vpop.permute.xlu0 %1044  ;;  %603 = vst.msk [vmem:[#allocation2 + $0x8] sm:$0x4] %vm601_vm7, %v598_v50 }
0x1586   :  { %1050 = vst.msk [vmem:[#allocation2 + $0x8] sm:$0x20] %vm1048_vm10, %v1045_v51 }
0x1588   :  { %v896_v52 = vpop.permute.xlu1 %895 }
0x1589   :  { %901 = vst.msk [vmem:[#allocation2 + $0x8] sm:$0x10] %vm899_vm9, %v896_v52 }
0x158c   :  { %v1194_v53 = vpop.permute.xlu1 %1193 }
0x158d   :  { %1199 = vst.msk [vmem:[#allocation2 + $0x8] sm:$0x40] %vm1197_vm11, %v1194_v53 }
0x15c6   :  { %v1513_v58 = vpop.f32.mrf.mxu0 }
0x15c7   :  { %v1518_v63 = vrot.slane %v1513_v58, 1 }
0x15c8   :  { %v2909_v59 = vpop.f32.mrf.mxu0 }
0x15e1   :  { %v1341_v54 = vpop.permute.xlu0 %1340 }
0x15e2   :  { %1347 = vst.msk [vmem:[#allocation2] sm:$0x80] %vm1346_vm12, %v1341_v54 }
0x15e5   :  { %v1343_v55 = vpop.permute.xlu0 %1342 }
0x15e6   :  { %1348 = vst.msk [vmem:[#allocation2 + $0x8] sm:$0x80] %vm1346_vm12, %v1343_v55 }
0x15e9   :  { %v1358_v56 = vld [vmem:[#allocation2] sm:$0xff] }
0x15ea   :  { %2896 = vmatprep.mubr.msk.f32.mxu1 %vm169_vm4, %v1358_v56 }
0x15ed   :  { %v1359_v57 = vld [vmem:[#allocation2 + $0x8] sm:$0xff] }
0x15ee   :  { %2897 = vmatmul.mubr.msk.f32.vlgmr.msra.gmra.mxu1 %vm169_vm4, %v1359_v57 }
0x15ef   :  { %2911 = vmatpush3.msra.mxu1 %v3667_v44  ;;  %2918 = vmatprep.mubr.msk.f32.mxu1 %vm3333_vm0, %v3332_v0 }
0x15f0   :  { %2912 = vmatprep.subr.mxu1 %v3332_v0 }
0x15f1   :  { %2913 = vmatpush3.msra.mxu1 %v3674_v21 }
0x15f2   :  { %2914 = vmatprep.subr.mxu1 %v3332_v0 }
0x15f3   :  { %2915 = vmatpush3.msra.mxu1 %v3680_v60 }
0x15f4   :  { %2916 = vmatprep.subr.mxu1 %v3332_v0 }
0x15f5   :  { %2917 = vmatpush3.msra.mxu1 %v3688_v45 }
0x15f6   :  { %2932 = vmatprep.subr.mxu1 %v3332_v0 }
0x16ae   :  { %v2898_v2 = vpop.f32.mrf.mxu1 }
0x16af   :  { %v3739_v3 = vadd.f32 %v2898_v2, %v2673_v62 }
0x16b0   :  { %v1438_v5 = vpop.f32.mrf.mxu1 }
0x16b1   :  { %v1522_v8 = vadd.f32 %v1518_v63, %v3739_v3  ;;  %v3742_v9 = vadd.f32 %v2673_v62, %v1438_v5 }
0x16b3   :  { %v1521_v11 = vadd.f32 %v1513_v58, %v3742_v9  ;;  %3135 = vtanh.f32 %v1522_v8  ;;  %v2677_v17 = vmul.f32 -1.442695, %v1522_v8 }
0x16b5   :  { %3137 = vtanh.f32 %v1521_v11  ;;  %v2676_v18 = vmul.f32 -1.442695, %v1521_v11 }
0x16b6   :  { %3139 = vpow2.f32 %v2677_v17 }
0x16b7   :  { %3141 = vpow2.f32 %v2676_v18 }
0x16c0   :  { %v3136_v15 = vpop.eup %3135 }
0x16c1   :  { %1543 = vrot.lane.b32.xlu1 %v3136_v15, %s3334_s15 }
0x16c2   :  { %v3138_v16 = vpop.eup %3137 }
0x16c3   :  { %1541 = vrot.lane.b32.xlu0 %v3138_v16, %s3334_s15  ;;  %v3140_v19 = vpop.eup %3139 }
0x16c4   :  { %v3142_v20 = vpop.eup %3141  ;;  %v1530_v23 = vadd.f32 1.0, %v3140_v19 }
0x16c5   :  { %v1529_v14 = vadd.f32 1.0, %v3142_v20 }
0x16c6   :  { %3143 = vrcp.f32 %v1530_v23 }
0x16c7   :  { %3145 = vrcp.f32 %v1529_v14 }
0x16d3   :  { %v3144_v10 = vpop.eup %3143 }
0x16d4   :  { %v3146_v26 = vpop.eup %3145  ;;  %v1538_v29 = vmul.f32 0.0, %v3144_v10 }
0x16d5   :  { %v1537_v34 = vmul.f32 0.0, %v3146_v26 }
0x1733   :  { %v1544_v24 = vpop.permute.xlu1 %1543 }
0x1734   :  { %v1548_v25 = vmul.f32 %v3144_v10, %v1544_v24 }
0x1735   :  { %v1542_v27 = vpop.permute.xlu0 %1541 }
0x1736   :  { %1553 = vrot.lane.b32.xlu1 %v1548_v25, %s3335_s3  ;;  %v1547_v28 = vmul.f32 %v3146_v26, %v1542_v27 }
0x1738   :  { %1551 = vrot.lane.b32.xlu0 %v1547_v28, %s3335_s3 }
0x17a8   :  { %v1554_v32 = vpop.permute.xlu1 %1553 }
0x17a9   :  { %v1558_v33 = vadd.f32 %v1554_v32, %v1538_v29 }
0x17aa   :  { %v1552_v35 = vpop.permute.xlu0 %1551 }
0x17ab   :  { %3147 = vtanh.f32 %v1558_v33  ;;  %v1557_v36 = vadd.f32 %v1552_v35, %v1537_v34  ;;  %v1672_v57 = vrot.slane %v1558_v33, 7 }
0x17ad   :  { %3149 = vtanh.f32 %v1557_v36  ;;  %v1671_v59 = vrot.slane %v1557_v36, 7 }
0x17b8   :  { %v3148_v37 = vpop.eup %3147 }
0x17b9   :  { %1565 = vrot.lane.b32.xlu1 %v3148_v37, %s3334_s15 }
0x17ba   :  { %v3150_v1 = vpop.eup %3149 }
0x17bb   :  { %1563 = vrot.lane.b32.xlu0 %v3150_v1, %s3334_s15 }
0x182b   :  { %v1566_v38 = vpop.permute.xlu1 %1565 }
0x182c   :  { %v1570_v41 = vmul.f32 %v3144_v10, %v1566_v38 }
0x182d   :  { %v1564_v61 = vpop.permute.xlu0 %1563 }
0x182e   :  { %v1573_v22 = vrot.slane %v1570_v41, 7  ;;  %v1569_v46 = vmul.f32 %v3146_v26, %v1564_v61 }
0x1830   :  { %v1574_v30 = vsel %vm309_vm3, %v1573_v22, %v1569_v46 }
0x1831   :  { %1575 = vrot.lane.b32.xlu1 %v1574_v30, %s3335_s3 }
0x18a3   :  { %v1576_v31 = vpop.permute.xlu1 %1575 }
0x18a4   :  { %2919 = vmatmul.mubr.msk.f32.vlgmr.msra.gmra.mxu1 %vm169_vm4, %v1576_v31 }
0x18a5   :  { %2933 = vmatpush3.msra.mxu1 %v3667_v44  ;;  %2940 = vmatprep.mubr.msk.f32.mxu1 %vm3333_vm0, %v3332_v0 }
0x18a6   :  { %2934 = vmatprep.subr.mxu1 %v3332_v0 }
0x18a7   :  { %2935 = vmatpush3.msra.mxu1 %v3674_v21 }
0x18a8   :  { %2936 = vmatprep.subr.mxu1 %v3332_v0 }
0x18a9   :  { %2937 = vmatpush3.msra.mxu1 %v3680_v60 }
0x18aa   :  { %2938 = vmatprep.subr.mxu1 %v3332_v0 }
0x18ab   :  { %2939 = vmatpush3.msra.mxu1 %v3688_v45 }
0x18ac   :  { %2954 = vmatprep.subr.mxu1 %v3332_v0 }
0x1964   :  { %v1645_v12 = vpop.f32.mrf.mxu1 }
0x1965   :  { %v1650_v13 = vrot.slane %v1645_v12, 7  ;;  %v1654_v39 = vadd.f32 %v1645_v12, %v3739_v3 }
0x1966   :  { %v2920_v40 = vpop.f32.mrf.mxu1 }
0x1967   :  { %v1653_v4 = vadd.f32 %v1650_v13, %v3742_v9  ;;  %3151 = vtanh.f32 %v1654_v39  ;;  %v2680_v7 = vmul.f32 -1.442695, %v1654_v39 }
0x1969   :  { %3153 = vtanh.f32 %v1653_v4  ;;  %v2679_v43 = vmul.f32 -1.442695, %v1653_v4 }
0x196a   :  { %3155 = vpow2.f32 %v2680_v7 }
0x196b   :  { %3157 = vpow2.f32 %v2679_v43 }
0x1974   :  { %v3152_v42 = vpop.eup %3151 }
0x1975   :  { %1681 = vrot.lane.b32.xlu1 %v3152_v42, %s3334_s15 }
0x1976   :  { %v3154_v6 = vpop.eup %3153 }
0x1977   :  { %1679 = vrot.lane.b32.xlu0 %v3154_v6, %s3334_s15  ;;  %v3156_v47 = vpop.eup %3155 }
0x1978   :  { %v3158_v48 = vpop.eup %3157  ;;  %v1662_v49 = vadd.f32 1.0, %v3156_v47 }
0x1979   :  { %v1661_v50 = vadd.f32 1.0, %v3158_v48 }
0x197a   :  { %3159 = vrcp.f32 %v1662_v49 }
0x197b   :  { %3161 = vrcp.f32 %v1661_v50 }
0x1987   :  { %v3160_v51 = vpop.eup %3159 }
0x1988   :  { %v3162_v54 = vpop.eup %3161  ;;  %v1676_v58 = vmul.f32 %v3160_v51, %v1672_v57 }
0x1989   :  { %v1675_v2 = vmul.f32 %v3162_v54, %v1671_v59 }
0x19e7   :  { %v1682_v52 = vpop.permute.xlu1 %1681 }
0x19e8   :  { %v1686_v53 = vmul.f32 %v3160_v51, %v1682_v52 }
0x19e9   :  { %v1680_v55 = vpop.permute.xlu0 %1679 }
0x19ea   :  { %1691 = vrot.lane.b32.xlu1 %v1686_v53, %s3335_s3  ;;  %v1685_v56 = vmul.f32 %v3162_v54, %v1680_v55 }
0x19ec   :  { %1689 = vrot.lane.b32.xlu0 %v1685_v56, %s3335_s3 }
0x1a5c   :  { %v1692_v62 = vpop.permute.xlu1 %1691 }
0x1a5d   :  { %v1696_v63 = vadd.f32 %v1692_v62, %v1676_v58 }
0x1a5e   :  { %v1690_v5 = vpop.permute.xlu0 %1689 }
0x1a5f   :  { %3163 = vtanh.f32 %v1696_v63  ;;  %v1695_v8 = vadd.f32 %v1690_v5, %v1675_v2  ;;  %v1811_v12 = vrot.slane %v1696_v63, 7 }
0x1a61   :  { %3165 = vtanh.f32 %v1695_v8  ;;  %v1810_v31 = vrot.slane %v1695_v8, 7 }
0x1a6c   :  { %v3164_v11 = vpop.eup %3163 }
0x1a6d   :  { %1703 = vrot.lane.b32.xlu1 %v3164_v11, %s3334_s15 }
0x1a6e   :  { %v3166_v15 = vpop.eup %3165 }
0x1a6f   :  { %1701 = vrot.lane.b32.xlu0 %v3166_v15, %s3334_s15 }
0x1adf   :  { %v1704_v16 = vpop.permute.xlu1 %1703 }
0x1ae0   :  { %v1708_v19 = vmul.f32 %v3160_v51, %v1704_v16 }
0x1ae1   :  { %v1702_v17 = vpop.permute.xlu0 %1701 }
0x1ae2   :  { %v1707_v18 = vmul.f32 %v3162_v54, %v1702_v17 }
0x1ae4   :  { %v1711_v20 = vrot.slane %v1707_v18, 1 }
0x1ae6   :  { %v1712_v23 = vsel %vm309_vm3, %v1708_v19, %v1711_v20 }
0x1ae7   :  { %1713 = vrot.lane.b32.xlu0 %v1712_v23, %s3335_s3 }
0x1b59   :  { %v1714_v14 = vpop.permute.xlu0 %1713 }
0x1b5a   :  { %2930 = vmatmul.mubr.msk.f32.vlgmr.msra.gmra.mxu0 %vm169_vm4, %v1714_v14 }
0x1b5b   :  { %2944 = vmatpush3.msra.mxu0 %v3667_v44  ;;  %2951 = vmatprep.mubr.msk.f32.mxu0 %vm3333_vm0, %v3332_v0 }
0x1b5c   :  { %2945 = vmatprep.subr.mxu0 %v3332_v0 }
0x1b5d   :  { %2946 = vmatpush3.msra.mxu0 %v3674_v21 }
0x1b5e   :  { %2947 = vmatprep.subr.mxu0 %v3332_v0 }
0x1b5f   :  { %2948 = vmatpush3.msra.mxu0 %v3680_v60 }
0x1b60   :  { %2949 = vmatprep.subr.mxu0 %v3332_v0 }
0x1b61   :  { %2950 = vmatpush3.msra.mxu0 %v3688_v45 }
0x1b62   :  { %2965 = vmatprep.subr.mxu0 %v3332_v0 }
0x1c1a   :  { %v1783_v10 = vpop.f32.mrf.mxu0 }
0x1c1b   :  { %v1788_v24 = vrot.slane %v1783_v10, 6  ;;  %v1789_v25 = vrot.slane %v1783_v10, 7 }
0x1c1c   :  { %v2931_v26 = vpop.f32.mrf.mxu0 }
0x1c1d   :  { %v1792_v27 = vadd.f32 %v1788_v24, %v3742_v9  ;;  %v1793_v28 = vadd.f32 %v1789_v25, %v3739_v3 }
0x1c1f   :  { %3167 = vtanh.f32 %v1792_v27  ;;  %v2682_v33 = vmul.f32 -1.442695, %v1792_v27  ;;  %v2683_v34 = vmul.f32 -1.442695, %v1793_v28 }
0x1c20   :  { %3169 = vtanh.f32 %v1793_v28 }
0x1c21   :  { %3171 = vpow2.f32 %v2682_v33 }
0x1c22   :  { %3173 = vpow2.f32 %v2683_v34 }
0x1c2c   :  { %v3168_v29 = vpop.eup %3167 }
0x1c2d   :  { %v3170_v32 = vpop.eup %3169  ;;  %1818 = vrot.lane.b32.xlu1 %v3168_v29, %s3334_s15 }
0x1c2e   :  { %1820 = vrot.lane.b32.xlu0 %v3170_v32, %s3334_s15  ;;  %v3172_v35 = vpop.eup %3171 }
0x1c2f   :  { %v3174_v36 = vpop.eup %3173  ;;  %v1800_v37 = vadd.f32 1.0, %v3172_v35 }
0x1c30   :  { %v1801_v1 = vadd.f32 1.0, %v3174_v36 }
0x1c31   :  { %3175 = vrcp.f32 %v1800_v37 }
0x1c32   :  { %3177 = vrcp.f32 %v1801_v1 }
0x1c3e   :  { %v3176_v38 = vpop.eup %3175 }
0x1c3f   :  { %v3178_v22 = vpop.eup %3177  ;;  %v1814_v13 = vmul.f32 %v3176_v38, %v1810_v31 }
0x1c40   :  { %v1815_v39 = vmul.f32 %v3178_v22, %v1811_v12 }
0x1c9f   :  { %v1819_v41 = vpop.permute.xlu1 %1818 }
0x1ca0   :  { %v1821_v61 = vpop.permute.xlu0 %1820  ;;  %v1824_v46 = vmul.f32 %v3176_v38, %v1819_v41 }
0x1ca1   :  { %v1825_v30 = vmul.f32 %v3178_v22, %v1821_v61 }
0x1ca2   :  { %1828 = vrot.lane.b32.xlu1 %v1824_v46, %s3335_s3 }
0x1ca3   :  { %1830 = vrot.lane.b32.xlu0 %v1825_v30, %s3335_s3 }
0x1d14   :  { %v1829_v40 = vpop.permute.xlu1 %1828 }
0x1d15   :  { %v1831_v4 = vpop.permute.xlu0 %1830  ;;  %v1834_v42 = vadd.f32 %v1829_v40, %v1814_v13 }
0x1d16   :  { %v1835_v6 = vadd.f32 %v1831_v4, %v1815_v39 }
0x1d17   :  { %3179 = vtanh.f32 %v1834_v42  ;;  %v1950_v24 = vrot.slane %v1834_v42, 7 }
0x1d18   :  { %3181 = vtanh.f32 %v1835_v6  ;;  %v1951_v25 = vrot.slane %v1835_v6, 7 }
0x1d24   :  { %v3180_v7 = vpop.eup %3179 }
0x1d25   :  { %v3182_v43 = vpop.eup %3181  ;;  %1840 = vrot.lane.b32.xlu1 %v3180_v7, %s3334_s15 }
0x1d26   :  { %1842 = vrot.lane.b32.xlu0 %v3182_v43, %s3334_s15 }
0x1d97   :  { %v1841_v47 = vpop.permute.xlu1 %1840 }
0x1d98   :  { %v1843_v48 = vpop.permute.xlu0 %1842  ;;  %v1846_v49 = vmul.f32 %v3176_v38, %v1841_v47 }
0x1d99   :  { %v1847_v50 = vmul.f32 %v3178_v22, %v1843_v48 }
0x1d9a   :  { %v1850_v51 = vrot.slane %v1846_v49, 2 }
0x1d9b   :  { %v1851_v52 = vrot.slane %v1847_v50, 1 }
0x1d9d   :  { %v1852_v53 = vsel %vm309_vm3, %v1851_v52, %v1850_v51 }
0x1d9e   :  { %1853 = vrot.lane.b32.xlu1 %v1852_v53, %s3335_s3 }
0x1e10   :  { %v1854_v54 = vpop.permute.xlu1 %1853 }
0x1e11   :  { %2941 = vmatmul.mubr.msk.f32.vlgmr.msra.gmra.mxu1 %vm169_vm4, %v1854_v54 }
0x1e12   :  { %2955 = vmatpush3.msra.mxu1 %v3667_v44  ;;  %2962 = vmatprep.mubr.msk.f32.mxu1 %vm3333_vm0, %v3332_v0 }
0x1e13   :  { %2956 = vmatprep.subr.mxu1 %v3332_v0 }
0x1e14   :  { %2957 = vmatpush3.msra.mxu1 %v3674_v21 }
0x1e15   :  { %2958 = vmatprep.subr.mxu1 %v3332_v0 }
0x1e16   :  { %2959 = vmatpush3.msra.mxu1 %v3680_v60 }
0x1e17   :  { %2960 = vmatprep.subr.mxu1 %v3332_v0 }
0x1e18   :  { %2961 = vmatpush3.msra.mxu1 %v3688_v45 }
0x1e19   :  { %2976 = vmatprep.subr.mxu1 %v3332_v0 }
0x1ed1   :  { %v1923_v55 = vpop.f32.mrf.mxu1 }
0x1ed2   :  { %v1928_v56 = vrot.slane %v1923_v55, 5  ;;  %v1929_v57 = vrot.slane %v1923_v55, 6 }
0x1ed3   :  { %v2942_v58 = vpop.f32.mrf.mxu1 }
0x1ed4   :  { %v1932_v59 = vadd.f32 %v1928_v56, %v3742_v9  ;;  %v1933_v62 = vadd.f32 %v1929_v57, %v3739_v3 }
0x1ed6   :  { %3183 = vtanh.f32 %v1932_v59  ;;  %v2685_v5 = vmul.f32 -1.442695, %v1932_v59  ;;  %v2686_v8 = vmul.f32 -1.442695, %v1933_v62 }
0x1ed7   :  { %3185 = vtanh.f32 %v1933_v62 }
0x1ed8   :  { %3187 = vpow2.f32 %v2685_v5 }
0x1ed9   :  { %3189 = vpow2.f32 %v2686_v8 }
0x1ee3   :  { %v3184_v63 = vpop.eup %3183 }
0x1ee4   :  { %v3186_v2 = vpop.eup %3185  ;;  %1958 = vrot.lane.b32.xlu0 %v3184_v63, %s3334_s15 }
0x1ee5   :  { %1960 = vrot.lane.b32.xlu1 %v3186_v2, %s3334_s15  ;;  %v3188_v11 = vpop.eup %3187 }
0x1ee6   :  { %v3190_v15 = vpop.eup %3189  ;;  %v1940_v16 = vadd.f32 1.0, %v3188_v11 }
0x1ee7   :  { %v1941_v17 = vadd.f32 1.0, %v3190_v15 }
0x1ee8   :  { %3191 = vrcp.f32 %v1940_v16 }
0x1ee9   :  { %3193 = vrcp.f32 %v1941_v17 }
0x1ef5   :  { %v3192_v18 = vpop.eup %3191 }
0x1ef6   :  { %v3194_v20 = vpop.eup %3193  ;;  %v1954_v26 = vmul.f32 %v3192_v18, %v1950_v24 }
0x1ef7   :  { %v1955_v27 = vmul.f32 %v3194_v20, %v1951_v25 }
0x1f56   :  { %v1959_v19 = vpop.permute.xlu0 %1958 }
0x1f57   :  { %v1961_v23 = vpop.permute.xlu1 %1960  ;;  %v1964_v14 = vmul.f32 %v3192_v18, %v1959_v19 }
0x1f58   :  { %v1965_v10 = vmul.f32 %v3194_v20, %v1961_v23 }
0x1f59   :  { %1968 = vrot.lane.b32.xlu0 %v1964_v14, %s3335_s3 }
0x1f5a   :  { %1970 = vrot.lane.b32.xlu1 %v1965_v10, %s3335_s3 }
0x1fcb   :  { %v1969_v28 = vpop.permute.xlu0 %1968 }
0x1fcc   :  { %v1971_v29 = vpop.permute.xlu1 %1970  ;;  %v1974_v32 = vadd.f32 %v1969_v28, %v1954_v26 }
0x1fcd   :  { %v1975_v33 = vadd.f32 %v1971_v29, %v1955_v27 }
0x1fce   :  { %3195 = vtanh.f32 %v1974_v32  ;;  %v2090_v56 = vrot.slane %v1974_v32, 7 }
0x1fcf   :  { %3197 = vtanh.f32 %v1975_v33  ;;  %v2091_v57 = vrot.slane %v1975_v33, 7 }
0x1fdb   :  { %v3196_v34 = vpop.eup %3195 }
0x1fdc   :  { %v3198_v35 = vpop.eup %3197  ;;  %1980 = vrot.lane.b32.xlu0 %v3196_v34, %s3334_s15 }
0x1fdd   :  { %1982 = vrot.lane.b32.xlu1 %v3198_v35, %s3334_s15 }
0x204e   :  { %v1981_v36 = vpop.permute.xlu0 %1980 }
0x204f   :  { %v1983_v37 = vpop.permute.xlu1 %1982  ;;  %v1986_v1 = vmul.f32 %v3192_v18, %v1981_v36 }
0x2050   :  { %v1987_v38 = vmul.f32 %v3194_v20, %v1983_v37 }
0x2051   :  { %v1990_v41 = vrot.slane %v1986_v1, 3 }
0x2052   :  { %v1991_v22 = vrot.slane %v1987_v38, 2 }
0x2054   :  { %v1992_v61 = vsel %vm309_vm3, %v1991_v22, %v1990_v41 }
0x2055   :  { %1993 = vrot.lane.b32.xlu0 %v1992_v61, %s3335_s3 }
0x20c7   :  { %v1994_v46 = vpop.permute.xlu0 %1993 }
0x20c8   :  { %2952 = vmatmul.mubr.msk.f32.vlgmr.msra.gmra.mxu0 %vm169_vm4, %v1994_v46 }
0x20c9   :  { %2966 = vmatpush3.msra.mxu0 %v3667_v44  ;;  %2973 = vmatprep.mubr.msk.f32.mxu0 %vm3333_vm0, %v3332_v0 }
0x20ca   :  { %2967 = vmatprep.subr.mxu0 %v3332_v0 }
0x20cb   :  { %2968 = vmatpush3.msra.mxu0 %v3674_v21 }
0x20cc   :  { %2969 = vmatprep.subr.mxu0 %v3332_v0 }
0x20cd   :  { %2970 = vmatpush3.msra.mxu0 %v3680_v60 }
0x20ce   :  { %2971 = vmatprep.subr.mxu0 %v3332_v0 }
0x20cf   :  { %2972 = vmatpush3.msra.mxu0 %v3688_v45 }
0x20d0   :  { %2987 = vmatprep.subr.mxu0 %v3332_v0 }
0x2188   :  { %v2063_v30 = vpop.f32.mrf.mxu0 }
0x2189   :  { %v2068_v31 = vrot.slane %v2063_v30, 4  ;;  %v2069_v12 = vrot.slane %v2063_v30, 5 }
0x218a   :  { %v2953_v13 = vpop.f32.mrf.mxu0 }
0x218b   :  { %v2072_v39 = vadd.f32 %v2068_v31, %v3742_v9  ;;  %v2073_v40 = vadd.f32 %v2069_v12, %v3739_v3 }
0x218d   :  { %3199 = vtanh.f32 %v2072_v39  ;;  %v2688_v6 = vmul.f32 -1.442695, %v2072_v39  ;;  %v2689_v7 = vmul.f32 -1.442695, %v2073_v40 }
0x218e   :  { %3201 = vtanh.f32 %v2073_v40 }
0x218f   :  { %3203 = vpow2.f32 %v2688_v6 }
0x2190   :  { %3205 = vpow2.f32 %v2689_v7 }
0x219a   :  { %v3200_v4 = vpop.eup %3199 }
0x219b   :  { %v3202_v42 = vpop.eup %3201  ;;  %2098 = vrot.lane.b32.xlu1 %v3200_v4, %s3334_s15 }
0x219c   :  { %2100 = vrot.lane.b32.xlu0 %v3202_v42, %s3334_s15  ;;  %v3204_v43 = vpop.eup %3203 }
0x219d   :  { %v3206_v47 = vpop.eup %3205  ;;  %v2080_v48 = vadd.f32 1.0, %v3204_v43 }
0x219e   :  { %v2081_v49 = vadd.f32 1.0, %v3206_v47 }
0x219f   :  { %3207 = vrcp.f32 %v2080_v48 }
0x21a0   :  { %3209 = vrcp.f32 %v2081_v49 }
0x21ac   :  { %v3208_v50 = vpop.eup %3207 }
0x21ad   :  { %v3210_v52 = vpop.eup %3209  ;;  %v2094_v58 = vmul.f32 %v3208_v50, %v2090_v56 }
0x21ae   :  { %v2095_v59 = vmul.f32 %v3210_v52, %v2091_v57 }
0x220d   :  { %v2099_v51 = vpop.permute.xlu1 %2098 }
0x220e   :  { %v2101_v53 = vpop.permute.xlu0 %2100  ;;  %v2104_v54 = vmul.f32 %v3208_v50, %v2099_v51 }
0x220f   :  { %v2105_v55 = vmul.f32 %v3210_v52, %v2101_v53 }
0x2210   :  { %2108 = vrot.lane.b32.xlu1 %v2104_v54, %s3335_s3 }
0x2211   :  { %2110 = vrot.lane.b32.xlu0 %v2105_v55, %s3335_s3 }
0x2282   :  { %v2109_v62 = vpop.permute.xlu1 %2108 }
0x2283   :  { %v2111_v63 = vpop.permute.xlu0 %2110  ;;  %v2114_v2 = vadd.f32 %v2109_v62, %v2094_v58 }
0x2284   :  { %v2115_v5 = vadd.f32 %v2111_v63, %v2095_v59 }
0x2285   :  { %3211 = vtanh.f32 %v2114_v2  ;;  %v2230_v22 = vrot.slane %v2114_v2, 7 }
0x2286   :  { %3213 = vtanh.f32 %v2115_v5  ;;  %v2231_v61 = vrot.slane %v2115_v5, 7 }
0x2292   :  { %v3212_v8 = vpop.eup %3211 }
0x2293   :  { %v3214_v11 = vpop.eup %3213  ;;  %2120 = vrot.lane.b32.xlu1 %v3212_v8, %s3334_s15 }
0x2294   :  { %2122 = vrot.lane.b32.xlu0 %v3214_v11, %s3334_s15 }
0x2305   :  { %v2121_v15 = vpop.permute.xlu1 %2120 }
0x2306   :  { %v2123_v16 = vpop.permute.xlu0 %2122  ;;  %v2126_v17 = vmul.f32 %v3208_v50, %v2121_v15 }
0x2307   :  { %v2127_v18 = vmul.f32 %v3210_v52, %v2123_v16 }
0x2308   :  { %v2130_v19 = vrot.slane %v2126_v17, 4 }
0x2309   :  { %v2131_v20 = vrot.slane %v2127_v18, 3 }
0x230b   :  { %v2132_v23 = vsel %vm309_vm3, %v2131_v20, %v2130_v19 }
0x230c   :  { %2133 = vrot.lane.b32.xlu1 %v2132_v23, %s3335_s3 }
0x237e   :  { %v2134_v14 = vpop.permute.xlu1 %2133 }
0x237f   :  { %2963 = vmatmul.mubr.msk.f32.vlgmr.msra.gmra.mxu1 %vm169_vm4, %v2134_v14 }
0x2380   :  { %2977 = vmatpush3.msra.mxu1 %v3667_v44  ;;  %2984 = vmatprep.mubr.msk.f32.mxu1 %vm3333_vm0, %v3332_v0 }
0x2381   :  { %2978 = vmatprep.subr.mxu1 %v3332_v0 }
0x2382   :  { %2979 = vmatpush3.msra.mxu1 %v3674_v21 }
0x2383   :  { %2980 = vmatprep.subr.mxu1 %v3332_v0 }
0x2384   :  { %2981 = vmatpush3.msra.mxu1 %v3680_v60 }
0x2385   :  { %2982 = vmatprep.subr.mxu1 %v3332_v0 }
0x2386   :  { %2983 = vmatpush3.msra.mxu1 %v3688_v45 }
0x243f   :  { %v2203_v10 = vpop.f32.mrf.mxu1 }
0x2440   :  { %v2208_v24 = vrot.slane %v2203_v10, 3  ;;  %v2209_v25 = vrot.slane %v2203_v10, 4 }
0x2441   :  { %v2964_v26 = vpop.f32.mrf.mxu1 }
0x2442   :  { %v2212_v44 = vadd.f32 %v2208_v24, %v3742_v9  ;;  %v2213_v27 = vadd.f32 %v2209_v25, %v3739_v3 }
0x2444   :  { %3215 = vtanh.f32 %v2212_v44  ;;  %v2691_v60 = vmul.f32 -1.442695, %v2212_v44  ;;  %v2692_v29 = vmul.f32 -1.442695, %v2213_v27 }
0x2445   :  { %3217 = vtanh.f32 %v2213_v27 }
0x2446   :  { %3219 = vpow2.f32 %v2691_v60 }
0x2447   :  { %3221 = vpow2.f32 %v2692_v29 }
0x2451   :  { %v3216_v28 = vpop.eup %3215 }
0x2452   :  { %v3218_v21 = vpop.eup %3217  ;;  %2238 = vrot.lane.b32.xlu0 %v3216_v28, %s3334_s15 }
0x2453   :  { %2240 = vrot.lane.b32.xlu1 %v3218_v21, %s3334_s15  ;;  %v3220_v45 = vpop.eup %3219 }
0x2454   :  { %v3222_v32 = vpop.eup %3221  ;;  %v2220_v33 = vadd.f32 1.0, %v3220_v45 }
0x2455   :  { %v2221_v34 = vadd.f32 1.0, %v3222_v32 }
0x2456   :  { %3223 = vrcp.f32 %v2220_v33 }
0x2457   :  { %3225 = vrcp.f32 %v2221_v34 }
0x2463   :  { %v3224_v35 = vpop.eup %3223 }
0x2464   :  { %v3226_v37 = vpop.eup %3225  ;;  %v2234_v46 = vmul.f32 %v3224_v35, %v2230_v22 }
0x2465   :  { %v2235_v30 = vmul.f32 %v3226_v37, %v2231_v61 }
0x24c4   :  { %v2239_v36 = vpop.permute.xlu0 %2238 }
0x24c5   :  { %v2241_v1 = vpop.permute.xlu1 %2240  ;;  %v2244_v38 = vmul.f32 %v3224_v35, %v2239_v36 }
0x24c6   :  { %v2245_v41 = vmul.f32 %v3226_v37, %v2241_v1 }
0x24c7   :  { %2248 = vrot.lane.b32.xlu0 %v2244_v38, %s3335_s3 }
0x24c8   :  { %2250 = vrot.lane.b32.xlu1 %v2245_v41, %s3335_s3 }
0x2539   :  { %v2249_v31 = vpop.permute.xlu0 %2248 }
0x253a   :  { %v2251_v12 = vpop.permute.xlu1 %2250  ;;  %v2254_v13 = vadd.f32 %v2249_v31, %v2234_v46 }
0x253b   :  { %v2255_v39 = vadd.f32 %v2251_v12, %v2235_v30 }
0x253c   :  { %3227 = vtanh.f32 %v2254_v13  ;;  %v2370_v20 = vrot.slane %v2254_v13, 7 }
0x253d   :  { %3229 = vtanh.f32 %v2255_v39  ;;  %v2371_v23 = vrot.slane %v2255_v39, 7 }
0x2549   :  { %v3228_v40 = vpop.eup %3227 }
0x254a   :  { %v3230_v4 = vpop.eup %3229  ;;  %2260 = vrot.lane.b32.xlu0 %v3228_v40, %s3334_s15 }
0x254b   :  { %2262 = vrot.lane.b32.xlu1 %v3230_v4, %s3334_s15 }
0x25bc   :  { %v2261_v42 = vpop.permute.xlu0 %2260 }
0x25bd   :  { %v2263_v6 = vpop.permute.xlu1 %2262  ;;  %v2266_v7 = vmul.f32 %v3224_v35, %v2261_v42 }
0x25be   :  { %v2267_v43 = vmul.f32 %v3226_v37, %v2263_v6 }
0x25bf   :  { %v2270_v47 = vrot.slane %v2266_v7, 5 }
0x25c0   :  { %v2271_v48 = vrot.slane %v2267_v43, 4 }
0x25c2   :  { %v2272_v49 = vsel %vm309_vm3, %v2271_v48, %v2270_v47 }
0x25c3   :  { %2273 = vrot.lane.b32.xlu0 %v2272_v49, %s3335_s3 }
0x2635   :  { %v2274_v50 = vpop.permute.xlu0 %2273 }
0x2636   :  { %2974 = vmatmul.mubr.msk.f32.vlgmr.msra.gmra.mxu0 %vm169_vm4, %v2274_v50 }
0x2637   :  { %2995 = vmatprep.mubr.msk.f32.mxu0 %vm3333_vm0, %v3332_v0 }
0x26f6   :  { %v2343_v51 = vpop.f32.mrf.mxu0 }
0x26f7   :  { %v2348_v52 = vrot.slane %v2343_v51, 2  ;;  %v2349_v53 = vrot.slane %v2343_v51, 3 }
0x26f8   :  { %v2975_v54 = vpop.f32.mrf.mxu0 }
0x26f9   :  { %v2352_v55 = vadd.f32 %v2348_v52, %v3742_v9  ;;  %v2353_v56 = vadd.f32 %v2349_v53, %v3739_v3  ;;  %v2551_v54 = vld [vmem:[%s3907_s7 + $0x18] sm:$0xff] }
0x26fa   :  { %2988 = vmatpush3.msra.mxu0 %v2551_v54 }
0x26fb   :  { %3231 = vtanh.f32 %v2352_v55  ;;  %v2694_v59 = vmul.f32 -1.442695, %v2352_v55  ;;  %v2695_v62 = vmul.f32 -1.442695, %v2353_v56  ;;  %v2550_v55 = vld [vmem:[%s3907_s7 + $0x10] sm:$0xff]  ;;  %2989 = vmatprep.subr.mxu0 %v3332_v0 }
0x26fc   :  { %3233 = vtanh.f32 %v2353_v56  ;;  %v2549_v56 = vld [vmem:[%s3907_s7 + $0x8] sm:$0xff]  ;;  %2990 = vmatpush3.msra.mxu0 %v2550_v55 }
0x26fd   :  { %3235 = vpow2.f32 %v2694_v59  ;;  %2991 = vmatprep.subr.mxu0 %v3332_v0 }
0x26fe   :  { %3237 = vpow2.f32 %v2695_v62  ;;  %2992 = vmatpush3.msra.mxu0 %v2549_v56 }
0x26ff   :  { %2993 = vmatprep.subr.mxu0 %v3332_v0  ;;  %v2699_v0 = vld [vmem:[#allocation7] ss:$0 sm:$0xff] }
0x2708   :  { %v3232_v57 = vpop.eup %3231 }
0x2709   :  { %v3234_v58 = vpop.eup %3233  ;;  %2378 = vrot.lane.b32.xlu1 %v3232_v57, %s3334_s15  ;;  %v2548_v57 = vld [vmem:[%s3907_s7] sm:$0xff] }
0x270a   :  { %2380 = vrot.lane.b32.xlu0 %v3234_v58, %s3334_s15  ;;  %v3236_v63 = vpop.eup %3235  ;;  %2994 = vmatpush3.msra.mxu0 %v2548_v57 }
0x270b   :  { %v3238_v2 = vpop.eup %3237  ;;  %v2360_v5 = vadd.f32 1.0, %v3236_v63 }
0x270c   :  { %v2361_v8 = vadd.f32 1.0, %v3238_v2 }
0x270d   :  { %3239 = vrcp.f32 %v2360_v5 }
0x270e   :  { %3241 = vrcp.f32 %v2361_v8 }
0x271a   :  { %v3240_v11 = vpop.eup %3239 }
0x271b   :  { %v3242_v16 = vpop.eup %3241  ;;  %v2374_v14 = vmul.f32 %v3240_v11, %v2370_v20 }
0x271c   :  { %v2375_v10 = vmul.f32 %v3242_v16, %v2371_v23 }
0x277b   :  { %v2379_v15 = vpop.permute.xlu1 %2378 }
0x277c   :  { %v2381_v17 = vpop.permute.xlu0 %2380  ;;  %v2384_v18 = vmul.f32 %v3240_v11, %v2379_v15 }
0x277d   :  { %v2385_v19 = vmul.f32 %v3242_v16, %v2381_v17 }
0x277e   :  { %2388 = vrot.lane.b32.xlu1 %v2384_v18, %s3335_s3 }
0x277f   :  { %2390 = vrot.lane.b32.xlu0 %v2385_v19, %s3335_s3 }
0x27f0   :  { %v2389_v24 = vpop.permute.xlu1 %2388 }
0x27f1   :  { %v2391_v25 = vpop.permute.xlu0 %2390  ;;  %v2394_v26 = vadd.f32 %v2389_v24, %v2374_v14 }
0x27f2   :  { %v2395_v44 = vadd.f32 %v2391_v25, %v2375_v10 }
0x27f3   :  { %3243 = vtanh.f32 %v2394_v26  ;;  %v2510_v43 = vrot.slane %v2394_v26, 7 }
0x27f4   :  { %3245 = vtanh.f32 %v2395_v44  ;;  %v2511_v47 = vrot.slane %v2395_v44, 7 }
0x2800   :  { %v3244_v27 = vpop.eup %3243 }
0x2801   :  { %v3246_v28 = vpop.eup %3245  ;;  %2400 = vrot.lane.b32.xlu1 %v3244_v27, %s3334_s15 }
0x2802   :  { %2402 = vrot.lane.b32.xlu0 %v3246_v28, %s3334_s15 }
0x2873   :  { %v2401_v21 = vpop.permute.xlu1 %2400 }
0x2874   :  { %v2403_v60 = vpop.permute.xlu0 %2402  ;;  %v2406_v29 = vmul.f32 %v3240_v11, %v2401_v21 }
0x2875   :  { %v2407_v45 = vmul.f32 %v3242_v16, %v2403_v60 }
0x2876   :  { %v2410_v32 = vrot.slane %v2406_v29, 6 }
0x2877   :  { %v2411_v33 = vrot.slane %v2407_v45, 5 }
0x2879   :  { %v2412_v34 = vsel %vm309_vm3, %v2411_v33, %v2410_v32 }
0x287a   :  { %2413 = vrot.lane.b32.xlu1 %v2412_v34, %s3335_s3 }
0x28ec   :  { %v2414_v35 = vpop.permute.xlu1 %2413 }
0x28ed   :  { %2985 = vmatmul.mubr.msk.f32.vlgmr.msra.gmra.mxu1 %vm169_vm4, %v2414_v35 }
0x29ad   :  { %v2483_v36 = vpop.f32.mrf.mxu1 }
0x29ae   :  { %v2488_v37 = vrot.slane %v2483_v36, 1  ;;  %v2489_v1 = vrot.slane %v2483_v36, 2 }
0x29af   :  { %v2986_v38 = vpop.f32.mrf.mxu1 }
0x29b0   :  { %v2492_v41 = vadd.f32 %v2488_v37, %v3742_v9  ;;  %v2493_v22 = vadd.f32 %v2489_v1, %v3739_v3 }
0x29b2   :  { %3247 = vtanh.f32 %v2492_v41  ;;  %v2697_v30 = vmul.f32 -1.442695, %v2492_v41  ;;  %v2698_v31 = vmul.f32 -1.442695, %v2493_v22 }
0x29b3   :  { %3249 = vtanh.f32 %v2493_v22 }
0x29b4   :  { %3251 = vpow2.f32 %v2697_v30 }
0x29b5   :  { %3253 = vpow2.f32 %v2698_v31 }
0x29bf   :  { %v3248_v61 = vpop.eup %3247 }
0x29c0   :  { %v3250_v46 = vpop.eup %3249  ;;  %2518 = vrot.lane.b32.xlu0 %v3248_v61, %s3334_s15 }
0x29c1   :  { %2520 = vrot.lane.b32.xlu1 %v3250_v46, %s3334_s15  ;;  %v3252_v12 = vpop.eup %3251 }
0x29c2   :  { %v3254_v13 = vpop.eup %3253  ;;  %v2500_v39 = vadd.f32 1.0, %v3252_v12 }
0x29c3   :  { %v2501_v40 = vadd.f32 1.0, %v3254_v13 }
0x29c4   :  { %3255 = vrcp.f32 %v2500_v39 }
0x29c5   :  { %3257 = vrcp.f32 %v2501_v40 }
0x29d1   :  { %v3256_v9 = vpop.eup %3255 }
0x29d2   :  { %v3258_v4 = vpop.eup %3257  ;;  %v2514_v48 = vmul.f32 %v3256_v9, %v2510_v43 }
0x29d3   :  { %v2515_v49 = vmul.f32 %v3258_v4, %v2511_v47 }
0x2a32   :  { %v2519_v3 = vpop.permute.xlu0 %2518 }
0x2a33   :  { %v2521_v42 = vpop.permute.xlu1 %2520  ;;  %v2524_v6 = vmul.f32 %v3256_v9, %v2519_v3 }
0x2a34   :  { %v2525_v7 = vmul.f32 %v3258_v4, %v2521_v42 }
0x2a35   :  { %2528 = vrot.lane.b32.xlu0 %v2524_v6, %s3335_s3 }
0x2a36   :  { %2530 = vrot.lane.b32.xlu1 %v2525_v7, %s3335_s3 }
0x2aa7   :  { %v2529_v50 = vpop.permute.xlu0 %2528 }
0x2aa8   :  { %v2531_v51 = vpop.permute.xlu1 %2530  ;;  %v2534_v52 = vadd.f32 %v2529_v50, %v2514_v48 }
0x2aa9   :  { %v2535_v53 = vadd.f32 %v2531_v51, %v2515_v49 }
0x2aaa   :  { %3259 = vtanh.f32 %v2534_v52 }
0x2aab   :  { %3261 = vtanh.f32 %v2535_v53 }
0x2ab7   :  { %v3260_v58 = vpop.eup %3259 }
0x2ab8   :  { %v3262_v59 = vpop.eup %3261  ;;  %2540 = vrot.lane.b32.xlu0 %v3260_v58, %s3334_s15 }
0x2ab9   :  { %2542 = vrot.lane.b32.xlu1 %v3262_v59, %s3334_s15 }
0x2b2a   :  { %v2541_v62 = vpop.permute.xlu0 %2540 }
0x2b2b   :  { %v2543_v63 = vpop.permute.xlu1 %2542  ;;  %v2546_v2 = vmul.f32 %v3256_v9, %v2541_v62 }
0x2b2c   :  { %v2547_v5 = vmul.f32 %v3258_v4, %v2543_v63 }
0x2b2d   :  { %v2561_v8 = vrot.slane %v2546_v2, 7 }
0x2b2e   :  { %v2562_v11 = vrot.slane %v2547_v5, 6 }
0x2b30   :  { %v2563_v15 = vsel %vm309_vm3, %v2562_v11, %v2561_v8 }
0x2b31   :  { %2564 = vrot.lane.b32.xlu0 %v2563_v15, %s3335_s3 }
0x2ba3   :  { %v2565_v16 = vpop.permute.xlu0 %2564 }
0x2ba4   :  { %2996 = vmatmul.mubr.msk.f32.vlgmr.msra.gmra.mxu0 %vm169_vm4, %v2565_v16 }
0x2c64   :  { %v2634_v17 = vpop.f32.mrf.mxu0 }
0x2c65   :  { %v2635_v18 = vadd.f32 %v2699_v0, %v2634_v17 }
0x2c66   :  { %v2997_v19 = vpop.f32.mrf.mxu0 }
0x2c67   :  { %2639 = vst.msk [vmem:[%s3909_s9] sm:$0x3] %vm2638_vm13, %v2635_v18 }
0x2c68   :  { %2644 = vsyncpa [#allocation4], 1 }
0x2c69   :  { %2645 = vsyncpa [#allocation6], 1 }

</bundles_post_ra>
